<compile_context>
chip_gen: v7x
topology: tpu7x:2x2x1
jax: 0.10.0
libtpu: 0.0.40
codegen_flags: <defaults>
</compile_context>

<pallas_src>
import functools

import jax
import jax.numpy as jnp
from jax.experimental import pallas as pl
from jax.experimental.pallas import tpu as pltpu

LANE = 128
MXU_DTYPE = jnp.bfloat16   # MXU-native operand dtype; accumulation stays f32.


def _round_up(n, m):
    return ((n + m - 1) // m) * m


@functools.lru_cache(maxsize=None)
def _vmem_budget_bytes(frac=0.75, fallback_cap=64 * 1024 * 1024):
    """~0.75 * per-core VMEM capacity: 48 MiB on v7x (64 MiB), ~96 MiB on v5e/v6e (128 MiB).
    Falls back to the v7x-safe 48 MiB if the query is unavailable."""
    try:
        cap = int(pltpu.get_tpu_info().vmem_capacity_bytes)
    except Exception:
        cap = fallback_cap
    return int(cap * frac)


def _pick_row_tile(n, max_tile=512):
    """Row tile for the hoisted input-projection matmul (sublane-aligned, bounded)."""
    if n <= max_tile:
        return _round_up(n, 16)      # bf16 output: 16-sublane aligned single block
    return max_tile                  # 512: multiple of 16, bounded VMEM block


def _pick_time_chunk(t, per_step_bytes, fixed_bytes, budget_bytes, max_chunk=64):
    """Largest divisor of t whose pipelined VMEM footprint fits the byte budget."""
    avail = budget_bytes - fixed_bytes
    cap = avail // max(per_step_bytes, 1)
    cap = max(1, min(int(cap), max_chunk, t))
    for d in range(cap, 0, -1):
        if t % d == 0:
            return d
    return 1


# ----------------------------------------------------------------------------
# Kernel 1: hoisted input projection -- one large MXU matmul instead of T tiny
# per-step projections on the serial critical path.  Emits bf16 (no bias): the
# f32 bias + recurrent accumulation happens in the recurrence kernel, halving
# the gx HBM round trip.
#   gx = x2d @ w_ih        x2d: (Np, Ep) bf16   w_ih: (Ep, 4*Hp) bf16  ->  (Np, 4*Hp) bf16
# ----------------------------------------------------------------------------
def input_proj_kernel(x_ref, w_ref, o_ref):
    o_ref[...] = jnp.dot(x_ref[...], w_ref[...],
                         preferred_element_type=jnp.float32).astype(o_ref.dtype)


def run_input_proj(x2d, w_ih, vmem_limit):
    n, ep = x2d.shape
    g = w_ih.shape[1]
    row_tile = _pick_row_tile(n)
    n_pad = _round_up(n, row_tile)
    if n_pad != n:
        x2d = jnp.pad(x2d, ((0, n_pad - n), (0, 0)))
    out = pl.pallas_call(
        input_proj_kernel,
        grid_spec=pltpu.PrefetchScalarGridSpec(
            num_scalar_prefetch=0,
            grid=(n_pad // row_tile,),
            in_specs=[
                pl.BlockSpec((row_tile, ep), lambda i: (i, 0)),   # streamed rows
                pl.BlockSpec((ep, g), lambda i: (0, 0)),          # resident weights
            ],
            out_specs=pl.BlockSpec((row_tile, g), lambda i: (i, 0)),
        ),
        out_shape=jax.ShapeDtypeStruct((n_pad, g), MXU_DTYPE),
        compiler_params=pltpu.CompilerParams(
            dimension_semantics=("parallel",),
            vmem_limit_bytes=int(vmem_limit)),
    )(x2d, w_ih)
    return out[:n]


# ----------------------------------------------------------------------------
# Kernel 2: LSTM recurrence over a T-chunk, streaming the bf16 precomputed gates.
#   Per step only the small h @ W_hh matmul + gate nonlinearities stay on the serial
#   path; h_new is staged into VMEM scratch.  For the last layer ONE chunk-level
#   FC + sigmoid + store happens after the loop (no per-step MXU / masked vst).
#   h/c are carried across grid steps in VMEM scratch; weights stay resident.
# ----------------------------------------------------------------------------
def lstm_rec_kernel(*refs, fuse_fc, unroll, num_f):
    if fuse_fc:
        (gx_ref, b_ref, w_hh_ref, w_fc_ref, b_fc_ref,
         out_ref, hn_ref, cn_ref, h_sc, c_sc, hseq_sc) = refs
    else:
        (gx_ref, b_ref, w_hh_ref,
         out_ref, hn_ref, cn_ref, h_sc, c_sc) = refs

    tc = gx_ref.shape[0]
    hp = hn_ref.shape[1]

    @pl.when(pl.program_id(0) == 0)
    def _init():
        h_sc[...] = jnp.zeros_like(h_sc)
        c_sc[...] = jnp.zeros_like(c_sc)

    w_hh = w_hh_ref[...]
    bias = b_ref[...]                       # fused b_ih + b_hh, f32, lane-padded

    def step(t, carry):
        h, c = carry
        # gates = x-projection (bf16, streamed) + bias + recurrent projection, f32 acc.
        gates = (gx_ref[t].astype(jnp.float32) + bias
                 + jnp.dot(h.astype(w_hh.dtype), w_hh,
                           preferred_element_type=jnp.float32))
        # Hp == 128*k, so every gate slice is a full lane-aligned tile.
        i = jax.nn.sigmoid(gates[:, 0 * hp:1 * hp])
        f = jax.nn.sigmoid(gates[:, 1 * hp:2 * hp])
        g = jnp.tanh(gates[:, 2 * hp:3 * hp])
        o = jax.nn.sigmoid(gates[:, 3 * hp:4 * hp])
        c_new = f * c + i * g
        h_new = o * jnp.tanh(c_new)
        if fuse_fc:
            hseq_sc[t] = h_new              # stage the chunk's hidden states in VMEM
        else:
            out_ref[t] = h_new.astype(out_ref.dtype)   # bf16 hidden seq -> next layer
        return h_new, c_new

    h_fin, c_fin = jax.lax.fori_loop(
        0, tc, step, (h_sc[...], c_sc[...]), unroll=unroll)
    h_sc[...] = h_fin
    c_sc[...] = c_fin

    if fuse_fc:
        # One chunk-level FC + sigmoid + store.  F is tiny (1 here), so the FC is a
        # VPU multiply + XLU lane reduction per output feature -- no reshapes, no
        # per-step MXU push, one store per chunk.
        # TODO(synk): for large out_features switch to a (tc*B, Hp) @ (Hp, Fp) MXU
        # matmul on a 2D time-major scratch with a 128-lane-padded Fp.
        hs = hseq_sc[...]                                         # (tc, B, Hp) f32
        cols = []
        for fo in range(num_f):
            wrow = w_fc_ref[fo:fo + 1, :]                         # (1, Hp) f32
            cols.append(jnp.sum(hs * wrow, axis=-1, keepdims=True))
        fc = cols[0] if num_f == 1 else jnp.concatenate(cols, axis=-1)
        out_ref[...] = jax.nn.sigmoid(fc + b_fc_ref[...])

    # Write the resident h_n / c_n blocks only once, on the final chunk.
    @pl.when(pl.program_id(0) == pl.num_programs(0) - 1)
    def _finalize():
        hn_ref[...] = h_fin
        cn_ref[...] = c_fin


def run_lstm_recurrence(gx, b, w_hh, w_fc_t, b_fc, *, fuse_fc, vmem_budget):
    t, bsz, g = gx.shape
    hp = w_hh.shape[0]
    num_f = w_fc_t.shape[0]

    # VMEM-byte-budgeted time chunk (gx double-buffer + out double-buffer + hseq scratch).
    per_step = 2 * bsz * g * 2                                    # gx (bf16), double-buffered
    if fuse_fc:
        per_step += 2 * bsz * num_f * 4                           # out (f32, F lanes)
        per_step += bsz * hp * 4                                  # hseq scratch (f32)
    else:
        per_step += 2 * bsz * hp * 2                              # out (bf16 hidden seq)
    fixed = (2 * hp * g * 2            # resident W_hh (double-buffered by default)
             + 2 * g * 4               # resident bias
             + 2 * num_f * hp * 4      # resident W_fc
             + 2 * 2 * bsz * hp * 4    # h/c scratch
             + (2 << 20))              # margin
    tc = _pick_time_chunk(t, per_step, fixed, vmem_budget)
    unroll = min(tc, 8)                # serial dependence: unrolling past ~8 only bloats code

    kernel = functools.partial(lstm_rec_kernel, fuse_fc=fuse_fc,
                               unroll=unroll, num_f=num_f)

    in_specs = [
        pl.BlockSpec((tc, bsz, g), lambda i: (i, 0, 0)),          # streamed gate chunks
        pl.BlockSpec((1, g), lambda i: (0, 0)),                   # resident fused bias
        pl.BlockSpec((hp, g), lambda i: (0, 0)),                  # resident W_hh
    ]
    args = [gx, b, w_hh]
    if fuse_fc:
        in_specs += [pl.BlockSpec((num_f, hp), lambda i: (0, 0)),  # resident W_fc (F, Hp)
                     pl.BlockSpec((1, num_f), lambda i: (0, 0))]   # resident b_fc
        args += [w_fc_t, b_fc]
        out_feat, out_dtype = num_f, jnp.float32
    else:
        out_feat, out_dtype = hp, MXU_DTYPE                        # bf16 inter-layer hseq

    scratch = [pltpu.VMEM((bsz, hp), jnp.float32),                 # carried h across chunks
               pltpu.VMEM((bsz, hp), jnp.float32)]                 # carried c across chunks
    if fuse_fc:
        scratch.append(pltpu.VMEM((tc, bsz, hp), jnp.float32))     # chunk hidden-state stage

    # TODO(synk): single-buffer the resident weight operands (pipeline_mode=pl.Buffered(1))
    # once verified on the target toolchain -- saves one weight copy of VMEM on v7x.
    # TODO(synk): for real batch sizes add a leading "parallel" batch grid axis (v7x 2nd TC)
    # and/or pack multiple independent sequences into the sublane dim at tiny B.
    return pl.pallas_call(
        kernel,
        grid_spec=pltpu.PrefetchScalarGridSpec(
            num_scalar_prefetch=0,
            grid=(t // tc,),
            in_specs=in_specs,
            out_specs=[
                pl.BlockSpec((tc, bsz, out_feat), lambda i: (i, 0, 0)),
                pl.BlockSpec((bsz, hp), lambda i: (0, 0)),         # resident h_n
                pl.BlockSpec((bsz, hp), lambda i: (0, 0)),         # resident c_n
            ],
            scratch_shapes=scratch,
        ),
        out_shape=(
            jax.ShapeDtypeStruct((t, bsz, out_feat), out_dtype),
            jax.ShapeDtypeStruct((bsz, hp), jnp.float32),
            jax.ShapeDtypeStruct((bsz, hp), jnp.float32),
        ),
        compiler_params=pltpu.CompilerParams(
            dimension_semantics=("arbitrary",),                    # time recurrence is serial
            vmem_limit_bytes=int(vmem_budget)),
    )(*args)


# ----------------------------------------------------------------------------
# Parameters: raw (PyTorch-layout) init + one-time prepare (transpose, fuse bias,
# pad E/H to the 128-lane width, cast MXU operands to bf16).
# ----------------------------------------------------------------------------
def init_params(key, vocab_size, embedding_dim, hidden_size, num_layers, out_features):
    keys = jax.random.split(key, 4 + 4 * num_layers)
    k = iter(keys)
    scale = 0.1
    params = {"embedding": scale * jax.random.normal(next(k), (vocab_size, embedding_dim), jnp.float32)}
    lstm = []
    for layer in range(num_layers):
        in_dim = embedding_dim if layer == 0 else hidden_size
        lstm.append({
            "w_ih": scale * jax.random.normal(next(k), (4 * hidden_size, in_dim), jnp.float32),
            "w_hh": scale * jax.random.normal(next(k), (4 * hidden_size, hidden_size), jnp.float32),
            "b_ih": scale * jax.random.normal(next(k), (4 * hidden_size,), jnp.float32),
            "b_hh": scale * jax.random.normal(next(k), (4 * hidden_size,), jnp.float32),
        })
    params["lstm"] = lstm
    params["fc_w"] = scale * jax.random.normal(next(k), (out_features, hidden_size), jnp.float32)
    params["fc_b"] = scale * jax.random.normal(next(k), (out_features,), jnp.float32)
    return params


def prepare_params(raw, mxu_dtype=MXU_DTYPE):
    """One-time: transpose, fuse b_ih+b_hh, pad each gate block to 128 lanes, cast bf16."""
    h = raw["lstm"][0]["w_hh"].shape[1]
    e = raw["embedding"].shape[1]
    f = raw["fc_w"].shape[0]
    hp = _round_up(h, LANE)
    ep = _round_up(e, LANE)

    def pad_gate_matrix(w, in_dim, in_dim_p):
        # w: (4H, in_dim) torch layout -> (in_dim_p, 4*Hp), per-gate lane-padded, transposed.
        out = jnp.zeros((in_dim_p, 4 * hp), jnp.float32)
        for gi in range(4):
            out = out.at[:in_dim, gi * hp:gi * hp + h].set(w[gi * h:(gi + 1) * h, :].T)
        return out.astype(mxu_dtype)

    def pad_gate_bias(bias):
        out = jnp.zeros((1, 4 * hp), jnp.float32)
        for gi in range(4):
            out = out.at[0, gi * hp:gi * hp + h].set(bias[gi * h:(gi + 1) * h])
        return out

    emb = jnp.zeros((raw["embedding"].shape[0], ep), jnp.float32)
    emb = emb.at[:, :e].set(raw["embedding"]).astype(mxu_dtype)

    layers = []
    for li, lp in enumerate(raw["lstm"]):
        in_dim, in_dim_p = (e, ep) if li == 0 else (h, hp)
        layers.append({
            "w_ih": pad_gate_matrix(lp["w_ih"], in_dim, in_dim_p),
            "w_hh": pad_gate_matrix(lp["w_hh"], h, hp),
            "b": pad_gate_bias(lp["b_ih"] + lp["b_hh"]),
        })

    # FC weight kept (F, Hp) f32 (it is consumed on the VPU in the fused chunk-level FC).
    fc_w_t = jnp.zeros((f, hp), jnp.float32).at[:, :h].set(raw["fc_w"])
    fc_b = raw["fc_b"].reshape(1, f).astype(jnp.float32)
    return {"embedding": emb, "lstm": layers, "fc_w_t": fc_w_t, "fc_b": fc_b}


# ----------------------------------------------------------------------------
# Forward pass mirroring SentimentLSTM.forward.
# ----------------------------------------------------------------------------
def sentiment_lstm_forward(input_words, params, hidden_size, out_features,
                           batch_size, vmem_budget):
    # TODO(synk): embedding gather stays in plain JAX (a Pallas TPU gather needs manual
    # per-row DMA); it is glue, not the hot path.
    embedded = jnp.take(params["embedding"], input_words, axis=0)    # (B, T, Ep) bf16
    bsz, t, _ = embedded.shape
    x = jnp.transpose(embedded, (1, 0, 2))                           # (T, B, Ep) time-major

    num_layers = len(params["lstm"])
    hn_list, cn_list = [], []
    sig = None
    for li, lp in enumerate(params["lstm"]):
        last = li == num_layers - 1
        # Hoisted input projection: one (T*B, E) @ (E, 4H) bf16 matmul per layer.
        x2d = x.reshape(t * bsz, x.shape[-1]).astype(MXU_DTYPE)
        gx = run_input_proj(x2d, lp["w_ih"], vmem_budget).reshape(t, bsz, -1)
        out, hn, cn = run_lstm_recurrence(
            gx, lp["b"], lp["w_hh"], params["fc_w_t"], params["fc_b"],
            fuse_fc=last, vmem_budget=vmem_budget)
        hn_list.append(hn[:, :hidden_size])
        cn_list.append(cn[:, :hidden_size])
        if last:
            sig = out                        # (T, B, F): fused fc + sigmoid
        else:
            x = out                          # (T, B, Hp) bf16 hidden sequence -> next layer

    # PyTorch: lstm_out.contiguous().view(-1, H) flattens batch-major (row = b*T + t);
    # our fused output is time-major, so one transpose in the wrapper restores that order.
    # The subsequent view(batch_size,-1).view(-1,8F)[:, -1] on a contiguous tensor is
    # exactly flat[8F-1 :: 8F] of that batch-major flatten, which is what this reproduces.
    sig_flat = jnp.transpose(sig, (1, 0, 2)).reshape(-1)             # (B*T*F,)
    assert sig_flat.shape[0] % batch_size == 0
    assert sig_flat.shape[0] % (8 * out_features) == 0, (
        "view(-1, 8*out_features) needs B*T*F divisible by 8*out_features")
    sigmoid_out = sig_flat.reshape(batch_size, -1).reshape(-1, 8 * out_features)
    sigmoid_last = sigmoid_out[:, -1]

    h = (jnp.stack(hn_list, axis=0), jnp.stack(cn_list, axis=0))     # (num_layers, B, H) each
    return sigmoid_last, h


# ----------------------------------------------------------------------------
# Pure-JAX f32 reference (PyTorch semantics) for a tolerance check.
# ----------------------------------------------------------------------------
def reference_forward(input_words, raw, hidden_size, out_features, batch_size):
    x = raw["embedding"][input_words]                                # (B, T, E) f32
    bsz, t, _ = x.shape
    h_layers, c_layers = [], []
    inp = x
    for lp in raw["lstm"]:
        w_ih, w_hh = lp["w_ih"], lp["w_hh"]
        b = lp["b_ih"] + lp["b_hh"]
        h = jnp.zeros((bsz, hidden_size), jnp.float32)
        c = jnp.zeros((bsz, hidden_size), jnp.float32)
        outs = []
        for ts in range(t):
            gates = inp[:, ts, :] @ w_ih.T + h @ w_hh.T + b
            i, f, g, o = jnp.split(gates, 4, axis=-1)
            i, f, o = jax.nn.sigmoid(i), jax.nn.sigmoid(f), jax.nn.sigmoid(o)
            g = jnp.tanh(g)
            c = f * c + i * g
            h = o * jnp.tanh(c)
            outs.append(h)
        inp = jnp.stack(outs, axis=1)                                # (B, T, H)
        h_layers.append(h)
        c_layers.append(c)
    lstm_out = inp.reshape(-1, hidden_size)
    sig = jax.nn.sigmoid(lstm_out @ raw["fc_w"].T + raw["fc_b"])
    sig = sig.reshape(batch_size, -1).reshape(-1, 8 * out_features)
    return sig[:, -1], (jnp.stack(h_layers), jnp.stack(c_layers))


if __name__ == "__main__":
    # small shapes consistent with the module's forward
    batch_size = 2          # plays the role of the module-level `batch_size`
    seq_len = 8             # the view(-1, 8 * out_features) implies B*T multiple of 8
    vocab_size = 50
    embedding_dim = 16
    hidden_size = 32
    num_layers = 1
    out_features = 1

    key = jax.random.PRNGKey(0)
    k_param, k_inp = jax.random.split(key)
    raw_params = init_params(k_param, vocab_size, embedding_dim, hidden_size,
                             num_layers, out_features)
    prepared = prepare_params(raw_params)
    input_words = jax.random.randint(k_inp, (batch_size, seq_len), 0, vocab_size,
                                     dtype=jnp.int32)

    vmem_budget = _vmem_budget_bytes()
    fwd = jax.jit(functools.partial(sentiment_lstm_forward,
                                    hidden_size=hidden_size,
                                    out_features=out_features,
                                    batch_size=batch_size,
                                    vmem_budget=vmem_budget))
    sigmoid_last, (h_n, c_n) = fwd(input_words, prepared)
    jax.block_until_ready((sigmoid_last, h_n, c_n))

    assert sigmoid_last.shape == (batch_size * seq_len // 8,)
    assert h_n.shape == (num_layers, batch_size, hidden_size)
    assert c_n.shape == (num_layers, batch_size, hidden_size)

    # Tolerance check against the pure-f32 reference (bf16 MXU operands => loose atol).
    ref_sig, (ref_h, ref_c) = reference_forward(
        input_words, raw_params, hidden_size, out_features, batch_size)
    assert jnp.allclose(sigmoid_last, ref_sig, atol=2e-2), "sigmoid_last mismatch"
    assert jnp.allclose(h_n, ref_h, atol=2e-2), "h_n mismatch"
    assert jnp.allclose(c_n, ref_c, atol=2e-2), "c_n mismatch"

    print("KERNEL_OK")
</pallas_src>

<mosaic_0001>
module attributes {stable_mosaic.version = 11 : i64} {
  func.func @input_proj_kernel(%arg0: i32, %arg1: memref<16x128xbf16, #tpu.memory_space<vmem>>, %arg2: memref<128x512xbf16, #tpu.memory_space<vmem>>, %arg3: memref<16x512xbf16, #tpu.memory_space<vmem>>) attributes {dimension_semantics = [#tpu.dimension_semantics<parallel>], iteration_bounds = array<i64: 1>, scalar_prefetch = 0 : i64, scratch_operands = 0 : i64, tpu.core_type = #tpu.core_type<tc>, window_params = [{transform_indices = @transform_0, window_bounds = array<i64: 16, 128>}, {pipeline_mode = #tpu.pipeline_mode<synchronous>, transform_indices = @transform_1, window_bounds = array<i64: 128, 512>}, {transform_indices = @transform_2, window_bounds = array<i64: 16, 512>}]} {
    %c0 = arith.constant 0 : index
    %c0_0 = arith.constant 0 : index
    %0 = vector.load %arg1[%c0, %c0_0] : memref<16x128xbf16, #tpu.memory_space<vmem>>, vector<16x128xbf16>
    %c0_1 = arith.constant 0 : index
    %c0_2 = arith.constant 0 : index
    %1 = vector.load %arg2[%c0_1, %c0_2] : memref<128x512xbf16, #tpu.memory_space<vmem>>, vector<128x512xbf16>
    %cst = arith.constant dense<0.000000e+00> : vector<16x512xf32>
    %2 = tpu.matmul %0, %1, %cst {dimension_numbers = #tpu.dot_dimension_numbers<[1], [0], [0], [1], [0, 0, 1, 1], [], []>} : vector<16x128xbf16>, vector<128x512xbf16>, vector<16x512xf32> -> vector<16x512xf32>
    %3 = arith.truncf %2 : vector<16x512xf32> to vector<16x512xbf16>
    %c0_3 = arith.constant 0 : index
    %c0_4 = arith.constant 0 : index
    %4 = vector.load %arg3[%c0_3, %c0_4] : memref<16x512xbf16, #tpu.memory_space<vmem>>, vector<16x512xbf16>
    tpu.vector_store %arg3[%c0_3, %c0_4], %3 {strides = array<i32>} : memref<16x512xbf16, #tpu.memory_space<vmem>>, vector<16x512xbf16>,
    return
  }
  func.func @transform_0(%arg0: i32) -> (i32, i32) {
    %c0_i32 = arith.constant 0 : i32
    %c0_i32_0 = arith.constant 0 : i32
    return %arg0, %c0_i32 : i32, i32
  }
  func.func @transform_1(%arg0: i32) -> (i32, i32) {
    %c0_i32 = arith.constant 0 : i32
    %c0_i32_0 = arith.constant 0 : i32
    %c0_i32_1 = arith.constant 0 : i32
    return %c0_i32, %c0_i32_0 : i32, i32
  }
  func.func @transform_2(%arg0: i32) -> (i32, i32) {
    %c0_i32 = arith.constant 0 : i32
    %c0_i32_0 = arith.constant 0 : i32
    return %arg0, %c0_i32 : i32, i32
  }
}

module attributes {stable_mosaic.version = 11 : i64} {
  func.func @lstm_rec_kernel(%arg0: i32, %arg1: memref<8x2x512xbf16, #tpu.memory_space<vmem>>, %arg2: memref<1x512xf32, #tpu.memory_space<vmem>>, %arg3: memref<128x512xbf16, #tpu.memory_space<vmem>>, %arg4: memref<1x128xf32, #tpu.memory_space<vmem>>, %arg5: memref<1x1xf32, #tpu.memory_space<vmem>>, %arg6: memref<8x2x1xf32, #tpu.memory_space<vmem>>, %arg7: memref<2x128xf32, #tpu.memory_space<vmem>>, %arg8: memref<2x128xf32, #tpu.memory_space<vmem>>, %arg9: memref<2x128xf32, #tpu.memory_space<vmem>>, %arg10: memref<2x128xf32, #tpu.memory_space<vmem>>, %arg11: memref<8x2x128xf32, #tpu.memory_space<vmem>>) attributes {dimension_semantics = [#tpu.dimension_semantics<arbitrary>], iteration_bounds = array<i64: 1>, scalar_prefetch = 0 : i64, scratch_operands = 3 : i64, tpu.core_type = #tpu.core_type<tc>, window_params = [{transform_indices = @transform_0, window_bounds = array<i64: 8, 2, 512>}, {pipeline_mode = #tpu.pipeline_mode<synchronous>, transform_indices = @transform_1, window_bounds = array<i64: 1, 512>}, {pipeline_mode = #tpu.pipeline_mode<synchronous>, transform_indices = @transform_2, window_bounds = array<i64: 128, 512>}, {pipeline_mode = #tpu.pipeline_mode<synchronous>, transform_indices = @transform_3, window_bounds = array<i64: 1, 128>}, {pipeline_mode = #tpu.pipeline_mode<synchronous>, transform_indices = @transform_4, window_bounds = array<i64: 1, 1>}, {transform_indices = @transform_5, window_bounds = array<i64: 8, 2, 1>}, {pipeline_mode = #tpu.pipeline_mode<synchronous>, transform_indices = @transform_6, window_bounds = array<i64: 2, 128>}, {pipeline_mode = #tpu.pipeline_mode<synchronous>, transform_indices = @transform_7, window_bounds = array<i64: 2, 128>}]} {
    %c0_i32 = arith.constant 0 : i32
    %0 = arith.cmpi eq, %arg0, %c0_i32 : i32
    %1 = arith.extui %0 : i1 to i32
    %c0_i32_0 = arith.constant 0 : i32
    %2 = arith.cmpi ne, %1, %c0_i32_0 : i32
    scf.if %2 {
      %cst_90 = arith.constant 0.000000e+00 : f32
      %333 = vector.broadcast %cst_90 : f32 to vector<2x128xf32>
      %c0_91 = arith.constant 0 : index
      %c0_92 = arith.constant 0 : index
      %334 = vector.load %arg9[%c0_91, %c0_92] : memref<2x128xf32, #tpu.memory_space<vmem>>, vector<2x128xf32>
      tpu.vector_store %arg9[%c0_91, %c0_92], %333 {strides = array<i32>} : memref<2x128xf32, #tpu.memory_space<vmem>>, vector<2x128xf32>,
      %cst_93 = arith.constant 0.000000e+00 : f32
      %335 = vector.broadcast %cst_93 : f32 to vector<2x128xf32>
      %c0_94 = arith.constant 0 : index
      %c0_95 = arith.constant 0 : index
      %336 = vector.load %arg10[%c0_94, %c0_95] : memref<2x128xf32, #tpu.memory_space<vmem>>, vector<2x128xf32>
      tpu.vector_store %arg10[%c0_94, %c0_95], %335 {strides = array<i32>} : memref<2x128xf32, #tpu.memory_space<vmem>>, vector<2x128xf32>,
    } else {
    }
    %c0 = arith.constant 0 : index
    %c0_1 = arith.constant 0 : index
    %3 = vector.load %arg3[%c0, %c0_1] : memref<128x512xbf16, #tpu.memory_space<vmem>>, vector<128x512xbf16>
    %c0_2 = arith.constant 0 : index
    %c0_3 = arith.constant 0 : index
    %4 = vector.load %arg2[%c0_2, %c0_3] : memref<1x512xf32, #tpu.memory_space<vmem>>, vector<1x512xf32>
    %c0_4 = arith.constant 0 : index
    %c0_5 = arith.constant 0 : index
    %5 = vector.load %arg9[%c0_4, %c0_5] : memref<2x128xf32, #tpu.memory_space<vmem>>, vector<2x128xf32>
    %c0_6 = arith.constant 0 : index
    %c0_7 = arith.constant 0 : index
    %6 = vector.load %arg10[%c0_6, %c0_7] : memref<2x128xf32, #tpu.memory_space<vmem>>, vector<2x128xf32>
    %c0_i32_8 = arith.constant 0 : i32
    %7 = arith.index_cast %c0_i32_8 : i32 to index
    %c0_9 = arith.constant 0 : index
    %c0_10 = arith.constant 0 : index
    %8 = vector.load %arg1[%7, %c0_9, %c0_10] : memref<8x2x512xbf16, #tpu.memory_space<vmem>>, vector<1x2x512xbf16>
    %9 = vector.shape_cast %8 : vector<1x2x512xbf16> to vector<2x512xbf16>
    %10 = arith.extf %9 : vector<2x512xbf16> to vector<2x512xf32>
    %11 = vector.broadcast %4 : vector<1x512xf32> to vector<2x512xf32>
    %12 = arith.addf %10, %11 : vector<2x512xf32>
    %13 = arith.truncf %5 : vector<2x128xf32> to vector<2x128xbf16>
    %cst = arith.constant dense<0.000000e+00> : vector<2x512xf32>
    %14 = tpu.matmul %13, %3, %cst {dimension_numbers = #tpu.dot_dimension_numbers<[1], [0], [0], [1], [0, 0, 1, 1], [], []>} : vector<2x128xbf16>, vector<128x512xbf16>, vector<2x512xf32> -> vector<2x512xf32>
    %15 = arith.addf %12, %14 : vector<2x512xf32>
    %16 = vector.extract_strided_slice %15 {offsets = [0, 0], sizes = [2, 128], strides = [1, 1]} : vector<2x512xf32> to vector<2x128xf32>
    %17 = arith.negf %16 : vector<2x128xf32>
    %18 = math.exp %17 : vector<2x128xf32>
    %cst_11 = arith.constant 1.000000e+00 : f32
    %19 = vector.broadcast %cst_11 : f32 to vector<2x128xf32>
    %20 = arith.addf %19, %18 : vector<2x128xf32>
    %21 = arith.divf %19, %20 : vector<2x128xf32>
    %22 = vector.extract_strided_slice %15 {offsets = [0, 128], sizes = [2, 128], strides = [1, 1]} : vector<2x512xf32> to vector<2x128xf32>
    %23 = arith.negf %22 : vector<2x128xf32>
    %24 = math.exp %23 : vector<2x128xf32>
    %cst_12 = arith.constant 1.000000e+00 : f32
    %25 = vector.broadcast %cst_12 : f32 to vector<2x128xf32>
    %26 = arith.addf %25, %24 : vector<2x128xf32>
    %27 = arith.divf %25, %26 : vector<2x128xf32>
    %28 = vector.extract_strided_slice %15 {offsets = [0, 256], sizes = [2, 128], strides = [1, 1]} : vector<2x512xf32> to vector<2x128xf32>
    %29 = math.tanh %28 : vector<2x128xf32>
    %30 = vector.extract_strided_slice %15 {offsets = [0, 384], sizes = [2, 128], strides = [1, 1]} : vector<2x512xf32> to vector<2x128xf32>
    %31 = arith.negf %30 : vector<2x128xf32>
    %32 = math.exp %31 : vector<2x128xf32>
    %cst_13 = arith.constant 1.000000e+00 : f32
    %33 = vector.broadcast %cst_13 : f32 to vector<2x128xf32>
    %34 = arith.addf %33, %32 : vector<2x128xf32>
    %35 = arith.divf %33, %34 : vector<2x128xf32>
    %36 = arith.mulf %27, %6 : vector<2x128xf32>
    %37 = arith.mulf %21, %29 : vector<2x128xf32>
    %38 = arith.addf %36, %37 : vector<2x128xf32>
    %39 = math.tanh %38 : vector<2x128xf32>
    %40 = arith.mulf %35, %39 : vector<2x128xf32>
    %41 = arith.index_cast %c0_i32_8 : i32 to index
    %c0_14 = arith.constant 0 : index
    %c0_15 = arith.constant 0 : index
    %42 = vector.load %arg11[%41, %c0_14, %c0_15] : memref<8x2x128xf32, #tpu.memory_space<vmem>>, vector<1x2x128xf32>
    %43 = vector.shape_cast %42 : vector<1x2x128xf32> to vector<2x128xf32>
    %44 = vector.shape_cast %40 : vector<2x128xf32> to vector<1x2x128xf32>
    tpu.vector_store %arg11[%41, %c0_14, %c0_15], %44 {strides = array<i32>} : memref<8x2x128xf32, #tpu.memory_space<vmem>>, vector<1x2x128xf32>,
    %c1_i32 = arith.constant 1 : i32
    %45 = arith.index_cast %c1_i32 : i32 to index
    %c0_16 = arith.constant 0 : index
    %c0_17 = arith.constant 0 : index
    %46 = vector.load %arg1[%45, %c0_16, %c0_17] : memref<8x2x512xbf16, #tpu.memory_space<vmem>>, vector<1x2x512xbf16>
    %47 = vector.shape_cast %46 : vector<1x2x512xbf16> to vector<2x512xbf16>
    %48 = arith.extf %47 : vector<2x512xbf16> to vector<2x512xf32>
    %49 = vector.broadcast %4 : vector<1x512xf32> to vector<2x512xf32>
    %50 = arith.addf %48, %49 : vector<2x512xf32>
    %51 = arith.truncf %40 : vector<2x128xf32> to vector<2x128xbf16>
    %cst_18 = arith.constant dense<0.000000e+00> : vector<2x512xf32>
    %52 = tpu.matmul %51, %3, %cst_18 {dimension_numbers = #tpu.dot_dimension_numbers<[1], [0], [0], [1], [0, 0, 1, 1], [], []>} : vector<2x128xbf16>, vector<128x512xbf16>, vector<2x512xf32> -> vector<2x512xf32>
    %53 = arith.addf %50, %52 : vector<2x512xf32>
    %54 = vector.extract_strided_slice %53 {offsets = [0, 0], sizes = [2, 128], strides = [1, 1]} : vector<2x512xf32> to vector<2x128xf32>
    %55 = arith.negf %54 : vector<2x128xf32>
    %56 = math.exp %55 : vector<2x128xf32>
    %cst_19 = arith.constant 1.000000e+00 : f32
    %57 = vector.broadcast %cst_19 : f32 to vector<2x128xf32>
    %58 = arith.addf %57, %56 : vector<2x128xf32>
    %59 = arith.divf %57, %58 : vector<2x128xf32>
    %60 = vector.extract_strided_slice %53 {offsets = [0, 128], sizes = [2, 128], strides = [1, 1]} : vector<2x512xf32> to vector<2x128xf32>
    %61 = arith.negf %60 : vector<2x128xf32>
    %62 = math.exp %61 : vector<2x128xf32>
    %cst_20 = arith.constant 1.000000e+00 : f32
    %63 = vector.broadcast %cst_20 : f32 to vector<2x128xf32>
    %64 = arith.addf %63, %62 : vector<2x128xf32>
    %65 = arith.divf %63, %64 : vector<2x128xf32>
    %66 = vector.extract_strided_slice %53 {offsets = [0, 256], sizes = [2, 128], strides = [1, 1]} : vector<2x512xf32> to vector<2x128xf32>
    %67 = math.tanh %66 : vector<2x128xf32>
    %68 = vector.extract_strided_slice %53 {offsets = [0, 384], sizes = [2, 128], strides = [1, 1]} : vector<2x512xf32> to vector<2x128xf32>
    %69 = arith.negf %68 : vector<2x128xf32>
    %70 = math.exp %69 : vector<2x128xf32>
    %cst_21 = arith.constant 1.000000e+00 : f32
    %71 = vector.broadcast %cst_21 : f32 to vector<2x128xf32>
    %72 = arith.addf %71, %70 : vector<2x128xf32>
    %73 = arith.divf %71, %72 : vector<2x128xf32>
    %74 = arith.mulf %65, %38 : vector<2x128xf32>
    %75 = arith.mulf %59, %67 : vector<2x128xf32>
    %76 = arith.addf %74, %75 : vector<2x128xf32>
    %77 = math.tanh %76 : vector<2x128xf32>
    %78 = arith.mulf %73, %77 : vector<2x128xf32>
    %79 = arith.index_cast %c1_i32 : i32 to index
    %c0_22 = arith.constant 0 : index
    %c0_23 = arith.constant 0 : index
    %80 = vector.load %arg11[%79, %c0_22, %c0_23] : memref<8x2x128xf32, #tpu.memory_space<vmem>>, vector<1x2x128xf32>
    %81 = vector.shape_cast %80 : vector<1x2x128xf32> to vector<2x128xf32>
    %82 = vector.shape_cast %78 : vector<2x128xf32> to vector<1x2x128xf32>
    tpu.vector_store %arg11[%79, %c0_22, %c0_23], %82 {strides = array<i32>} : memref<8x2x128xf32, #tpu.memory_space<vmem>>, vector<1x2x128xf32>,
    %c2_i32 = arith.constant 2 : i32
    %83 = arith.index_cast %c2_i32 : i32 to index
    %c0_24 = arith.constant 0 : index
    %c0_25 = arith.constant 0 : index
    %84 = vector.load %arg1[%83, %c0_24, %c0_25] : memref<8x2x512xbf16, #tpu.memory_space<vmem>>, vector<1x2x512xbf16>
    %85 = vector.shape_cast %84 : vector<1x2x512xbf16> to vector<2x512xbf16>
    %86 = arith.extf %85 : vector<2x512xbf16> to vector<2x512xf32>
    %87 = vector.broadcast %4 : vector<1x512xf32> to vector<2x512xf32>
    %88 = arith.addf %86, %87 : vector<2x512xf32>
    %89 = arith.truncf %78 : vector<2x128xf32> to vector<2x128xbf16>
    %cst_26 = arith.constant dense<0.000000e+00> : vector<2x512xf32>
    %90 = tpu.matmul %89, %3, %cst_26 {dimension_numbers = #tpu.dot_dimension_numbers<[1], [0], [0], [1], [0, 0, 1, 1], [], []>} : vector<2x128xbf16>, vector<128x512xbf16>, vector<2x512xf32> -> vector<2x512xf32>
    %91 = arith.addf %88, %90 : vector<2x512xf32>
    %92 = vector.extract_strided_slice %91 {offsets = [0, 0], sizes = [2, 128], strides = [1, 1]} : vector<2x512xf32> to vector<2x128xf32>
    %93 = arith.negf %92 : vector<2x128xf32>
    %94 = math.exp %93 : vector<2x128xf32>
    %cst_27 = arith.constant 1.000000e+00 : f32
    %95 = vector.broadcast %cst_27 : f32 to vector<2x128xf32>
    %96 = arith.addf %95, %94 : vector<2x128xf32>
    %97 = arith.divf %95, %96 : vector<2x128xf32>
    %98 = vector.extract_strided_slice %91 {offsets = [0, 128], sizes = [2, 128], strides = [1, 1]} : vector<2x512xf32> to vector<2x128xf32>
    %99 = arith.negf %98 : vector<2x128xf32>
    %100 = math.exp %99 : vector<2x128xf32>
    %cst_28 = arith.constant 1.000000e+00 : f32
    %101 = vector.broadcast %cst_28 : f32 to vector<2x128xf32>
    %102 = arith.addf %101, %100 : vector<2x128xf32>
    %103 = arith.divf %101, %102 : vector<2x128xf32>
    %104 = vector.extract_strided_slice %91 {offsets = [0, 256], sizes = [2, 128], strides = [1, 1]} : vector<2x512xf32> to vector<2x128xf32>
    %105 = math.tanh %104 : vector<2x128xf32>
    %106 = vector.extract_strided_slice %91 {offsets = [0, 384], sizes = [2, 128], strides = [1, 1]} : vector<2x512xf32> to vector<2x128xf32>
    %107 = arith.negf %106 : vector<2x128xf32>
    %108 = math.exp %107 : vector<2x128xf32>
    %cst_29 = arith.constant 1.000000e+00 : f32
    %109 = vector.broadcast %cst_29 : f32 to vector<2x128xf32>
    %110 = arith.addf %109, %108 : vector<2x128xf32>
    %111 = arith.divf %109, %110 : vector<2x128xf32>
    %112 = arith.mulf %103, %76 : vector<2x128xf32>
    %113 = arith.mulf %97, %105 : vector<2x128xf32>
    %114 = arith.addf %112, %113 : vector<2x128xf32>
    %115 = math.tanh %114 : vector<2x128xf32>
    %116 = arith.mulf %111, %115 : vector<2x128xf32>
    %117 = arith.index_cast %c2_i32 : i32 to index
    %c0_30 = arith.constant 0 : index
    %c0_31 = arith.constant 0 : index
    %118 = vector.load %arg11[%117, %c0_30, %c0_31] : memref<8x2x128xf32, #tpu.memory_space<vmem>>, vector<1x2x128xf32>
    %119 = vector.shape_cast %118 : vector<1x2x128xf32> to vector<2x128xf32>
    %120 = vector.shape_cast %116 : vector<2x128xf32> to vector<1x2x128xf32>
    tpu.vector_store %arg11[%117, %c0_30, %c0_31], %120 {strides = array<i32>} : memref<8x2x128xf32, #tpu.memory_space<vmem>>, vector<1x2x128xf32>,
    %c3_i32 = arith.constant 3 : i32
    %121 = arith.index_cast %c3_i32 : i32 to index
    %c0_32 = arith.constant 0 : index
    %c0_33 = arith.constant 0 : index
    %122 = vector.load %arg1[%121, %c0_32, %c0_33] : memref<8x2x512xbf16, #tpu.memory_space<vmem>>, vector<1x2x512xbf16>
    %123 = vector.shape_cast %122 : vector<1x2x512xbf16> to vector<2x512xbf16>
    %124 = arith.extf %123 : vector<2x512xbf16> to vector<2x512xf32>
    %125 = vector.broadcast %4 : vector<1x512xf32> to vector<2x512xf32>
    %126 = arith.addf %124, %125 : vector<2x512xf32>
    %127 = arith.truncf %116 : vector<2x128xf32> to vector<2x128xbf16>
    %cst_34 = arith.constant dense<0.000000e+00> : vector<2x512xf32>
    %128 = tpu.matmul %127, %3, %cst_34 {dimension_numbers = #tpu.dot_dimension_numbers<[1], [0], [0], [1], [0, 0, 1, 1], [], []>} : vector<2x128xbf16>, vector<128x512xbf16>, vector<2x512xf32> -> vector<2x512xf32>
    %129 = arith.addf %126, %128 : vector<2x512xf32>
    %130 = vector.extract_strided_slice %129 {offsets = [0, 0], sizes = [2, 128], strides = [1, 1]} : vector<2x512xf32> to vector<2x128xf32>
    %131 = arith.negf %130 : vector<2x128xf32>
    %132 = math.exp %131 : vector<2x128xf32>
    %cst_35 = arith.constant 1.000000e+00 : f32
    %133 = vector.broadcast %cst_35 : f32 to vector<2x128xf32>
    %134 = arith.addf %133, %132 : vector<2x128xf32>
    %135 = arith.divf %133, %134 : vector<2x128xf32>
    %136 = vector.extract_strided_slice %129 {offsets = [0, 128], sizes = [2, 128], strides = [1, 1]} : vector<2x512xf32> to vector<2x128xf32>
    %137 = arith.negf %136 : vector<2x128xf32>
    %138 = math.exp %137 : vector<2x128xf32>
    %cst_36 = arith.constant 1.000000e+00 : f32
    %139 = vector.broadcast %cst_36 : f32 to vector<2x128xf32>
    %140 = arith.addf %139, %138 : vector<2x128xf32>
    %141 = arith.divf %139, %140 : vector<2x128xf32>
    %142 = vector.extract_strided_slice %129 {offsets = [0, 256], sizes = [2, 128], strides = [1, 1]} : vector<2x512xf32> to vector<2x128xf32>
    %143 = math.tanh %142 : vector<2x128xf32>
    %144 = vector.extract_strided_slice %129 {offsets = [0, 384], sizes = [2, 128], strides = [1, 1]} : vector<2x512xf32> to vector<2x128xf32>
    %145 = arith.negf %144 : vector<2x128xf32>
    %146 = math.exp %145 : vector<2x128xf32>
    %cst_37 = arith.constant 1.000000e+00 : f32
    %147 = vector.broadcast %cst_37 : f32 to vector<2x128xf32>
    %148 = arith.addf %147, %146 : vector<2x128xf32>
    %149 = arith.divf %147, %148 : vector<2x128xf32>
    %150 = arith.mulf %141, %114 : vector<2x128xf32>
    %151 = arith.mulf %135, %143 : vector<2x128xf32>
    %152 = arith.addf %150, %151 : vector<2x128xf32>
    %153 = math.tanh %152 : vector<2x128xf32>
    %154 = arith.mulf %149, %153 : vector<2x128xf32>
    %155 = arith.index_cast %c3_i32 : i32 to index
    %c0_38 = arith.constant 0 : index
    %c0_39 = arith.constant 0 : index
    %156 = vector.load %arg11[%155, %c0_38, %c0_39] : memref<8x2x128xf32, #tpu.memory_space<vmem>>, vector<1x2x128xf32>
    %157 = vector.shape_cast %156 : vector<1x2x128xf32> to vector<2x128xf32>
    %158 = vector.shape_cast %154 : vector<2x128xf32> to vector<1x2x128xf32>
    tpu.vector_store %arg11[%155, %c0_38, %c0_39], %158 {strides = array<i32>} : memref<8x2x128xf32, #tpu.memory_space<vmem>>, vector<1x2x128xf32>,
    %c4_i32 = arith.constant 4 : i32
    %159 = arith.index_cast %c4_i32 : i32 to index
    %c0_40 = arith.constant 0 : index
    %c0_41 = arith.constant 0 : index
    %160 = vector.load %arg1[%159, %c0_40, %c0_41] : memref<8x2x512xbf16, #tpu.memory_space<vmem>>, vector<1x2x512xbf16>
    %161 = vector.shape_cast %160 : vector<1x2x512xbf16> to vector<2x512xbf16>
    %162 = arith.extf %161 : vector<2x512xbf16> to vector<2x512xf32>
    %163 = vector.broadcast %4 : vector<1x512xf32> to vector<2x512xf32>
    %164 = arith.addf %162, %163 : vector<2x512xf32>
    %165 = arith.truncf %154 : vector<2x128xf32> to vector<2x128xbf16>
    %cst_42 = arith.constant dense<0.000000e+00> : vector<2x512xf32>
    %166 = tpu.matmul %165, %3, %cst_42 {dimension_numbers = #tpu.dot_dimension_numbers<[1], [0], [0], [1], [0, 0, 1, 1], [], []>} : vector<2x128xbf16>, vector<128x512xbf16>, vector<2x512xf32> -> vector<2x512xf32>
    %167 = arith.addf %164, %166 : vector<2x512xf32>
    %168 = vector.extract_strided_slice %167 {offsets = [0, 0], sizes = [2, 128], strides = [1, 1]} : vector<2x512xf32> to vector<2x128xf32>
    %169 = arith.negf %168 : vector<2x128xf32>
    %170 = math.exp %169 : vector<2x128xf32>
    %cst_43 = arith.constant 1.000000e+00 : f32
    %171 = vector.broadcast %cst_43 : f32 to vector<2x128xf32>
    %172 = arith.addf %171, %170 : vector<2x128xf32>
    %173 = arith.divf %171, %172 : vector<2x128xf32>
    %174 = vector.extract_strided_slice %167 {offsets = [0, 128], sizes = [2, 128], strides = [1, 1]} : vector<2x512xf32> to vector<2x128xf32>
    %175 = arith.negf %174 : vector<2x128xf32>
    %176 = math.exp %175 : vector<2x128xf32>
    %cst_44 = arith.constant 1.000000e+00 : f32
    %177 = vector.broadcast %cst_44 : f32 to vector<2x128xf32>
    %178 = arith.addf %177, %176 : vector<2x128xf32>
    %179 = arith.divf %177, %178 : vector<2x128xf32>
    %180 = vector.extract_strided_slice %167 {offsets = [0, 256], sizes = [2, 128], strides = [1, 1]} : vector<2x512xf32> to vector<2x128xf32>
    %181 = math.tanh %180 : vector<2x128xf32>
    %182 = vector.extract_strided_slice %167 {offsets = [0, 384], sizes = [2, 128], strides = [1, 1]} : vector<2x512xf32> to vector<2x128xf32>
    %183 = arith.negf %182 : vector<2x128xf32>
    %184 = math.exp %183 : vector<2x128xf32>
    %cst_45 = arith.constant 1.000000e+00 : f32
    %185 = vector.broadcast %cst_45 : f32 to vector<2x128xf32>
    %186 = arith.addf %185, %184 : vector<2x128xf32>
    %187 = arith.divf %185, %186 : vector<2x128xf32>
    %188 = arith.mulf %179, %152 : vector<2x128xf32>
    %189 = arith.mulf %173, %181 : vector<2x128xf32>
    %190 = arith.addf %188, %189 : vector<2x128xf32>
    %191 = math.tanh %190 : vector<2x128xf32>
    %192 = arith.mulf %187, %191 : vector<2x128xf32>
    %193 = arith.index_cast %c4_i32 : i32 to index
    %c0_46 = arith.constant 0 : index
    %c0_47 = arith.constant 0 : index
    %194 = vector.load %arg11[%193, %c0_46, %c0_47] : memref<8x2x128xf32, #tpu.memory_space<vmem>>, vector<1x2x128xf32>
    %195 = vector.shape_cast %194 : vector<1x2x128xf32> to vector<2x128xf32>
    %196 = vector.shape_cast %192 : vector<2x128xf32> to vector<1x2x128xf32>
    tpu.vector_store %arg11[%193, %c0_46, %c0_47], %196 {strides = array<i32>} : memref<8x2x128xf32, #tpu.memory_space<vmem>>, vector<1x2x128xf32>,
    %c5_i32 = arith.constant 5 : i32
    %197 = arith.index_cast %c5_i32 : i32 to index
    %c0_48 = arith.constant 0 : index
    %c0_49 = arith.constant 0 : index
    %198 = vector.load %arg1[%197, %c0_48, %c0_49] : memref<8x2x512xbf16, #tpu.memory_space<vmem>>, vector<1x2x512xbf16>
    %199 = vector.shape_cast %198 : vector<1x2x512xbf16> to vector<2x512xbf16>
    %200 = arith.extf %199 : vector<2x512xbf16> to vector<2x512xf32>
    %201 = vector.broadcast %4 : vector<1x512xf32> to vector<2x512xf32>
    %202 = arith.addf %200, %201 : vector<2x512xf32>
    %203 = arith.truncf %192 : vector<2x128xf32> to vector<2x128xbf16>
    %cst_50 = arith.constant dense<0.000000e+00> : vector<2x512xf32>
    %204 = tpu.matmul %203, %3, %cst_50 {dimension_numbers = #tpu.dot_dimension_numbers<[1], [0], [0], [1], [0, 0, 1, 1], [], []>} : vector<2x128xbf16>, vector<128x512xbf16>, vector<2x512xf32> -> vector<2x512xf32>
    %205 = arith.addf %202, %204 : vector<2x512xf32>
    %206 = vector.extract_strided_slice %205 {offsets = [0, 0], sizes = [2, 128], strides = [1, 1]} : vector<2x512xf32> to vector<2x128xf32>
    %207 = arith.negf %206 : vector<2x128xf32>
    %208 = math.exp %207 : vector<2x128xf32>
    %cst_51 = arith.constant 1.000000e+00 : f32
    %209 = vector.broadcast %cst_51 : f32 to vector<2x128xf32>
    %210 = arith.addf %209, %208 : vector<2x128xf32>
    %211 = arith.divf %209, %210 : vector<2x128xf32>
    %212 = vector.extract_strided_slice %205 {offsets = [0, 128], sizes = [2, 128], strides = [1, 1]} : vector<2x512xf32> to vector<2x128xf32>
    %213 = arith.negf %212 : vector<2x128xf32>
    %214 = math.exp %213 : vector<2x128xf32>
    %cst_52 = arith.constant 1.000000e+00 : f32
    %215 = vector.broadcast %cst_52 : f32 to vector<2x128xf32>
    %216 = arith.addf %215, %214 : vector<2x128xf32>
    %217 = arith.divf %215, %216 : vector<2x128xf32>
    %218 = vector.extract_strided_slice %205 {offsets = [0, 256], sizes = [2, 128], strides = [1, 1]} : vector<2x512xf32> to vector<2x128xf32>
    %219 = math.tanh %218 : vector<2x128xf32>
    %220 = vector.extract_strided_slice %205 {offsets = [0, 384], sizes = [2, 128], strides = [1, 1]} : vector<2x512xf32> to vector<2x128xf32>
    %221 = arith.negf %220 : vector<2x128xf32>
    %222 = math.exp %221 : vector<2x128xf32>
    %cst_53 = arith.constant 1.000000e+00 : f32
    %223 = vector.broadcast %cst_53 : f32 to vector<2x128xf32>
    %224 = arith.addf %223, %222 : vector<2x128xf32>
    %225 = arith.divf %223, %224 : vector<2x128xf32>
    %226 = arith.mulf %217, %190 : vector<2x128xf32>
    %227 = arith.mulf %211, %219 : vector<2x128xf32>
    %228 = arith.addf %226, %227 : vector<2x128xf32>
    %229 = math.tanh %228 : vector<2x128xf32>
    %230 = arith.mulf %225, %229 : vector<2x128xf32>
    %231 = arith.index_cast %c5_i32 : i32 to index
    %c0_54 = arith.constant 0 : index
    %c0_55 = arith.constant 0 : index
    %232 = vector.load %arg11[%231, %c0_54, %c0_55] : memref<8x2x128xf32, #tpu.memory_space<vmem>>, vector<1x2x128xf32>
    %233 = vector.shape_cast %232 : vector<1x2x128xf32> to vector<2x128xf32>
    %234 = vector.shape_cast %230 : vector<2x128xf32> to vector<1x2x128xf32>
    tpu.vector_store %arg11[%231, %c0_54, %c0_55], %234 {strides = array<i32>} : memref<8x2x128xf32, #tpu.memory_space<vmem>>, vector<1x2x128xf32>,
    %c6_i32 = arith.constant 6 : i32
    %235 = arith.index_cast %c6_i32 : i32 to index
    %c0_56 = arith.constant 0 : index
    %c0_57 = arith.constant 0 : index
    %236 = vector.load %arg1[%235, %c0_56, %c0_57] : memref<8x2x512xbf16, #tpu.memory_space<vmem>>, vector<1x2x512xbf16>
    %237 = vector.shape_cast %236 : vector<1x2x512xbf16> to vector<2x512xbf16>
    %238 = arith.extf %237 : vector<2x512xbf16> to vector<2x512xf32>
    %239 = vector.broadcast %4 : vector<1x512xf32> to vector<2x512xf32>
    %240 = arith.addf %238, %239 : vector<2x512xf32>
    %241 = arith.truncf %230 : vector<2x128xf32> to vector<2x128xbf16>
    %cst_58 = arith.constant dense<0.000000e+00> : vector<2x512xf32>
    %242 = tpu.matmul %241, %3, %cst_58 {dimension_numbers = #tpu.dot_dimension_numbers<[1], [0], [0], [1], [0, 0, 1, 1], [], []>} : vector<2x128xbf16>, vector<128x512xbf16>, vector<2x512xf32> -> vector<2x512xf32>
    %243 = arith.addf %240, %242 : vector<2x512xf32>
    %244 = vector.extract_strided_slice %243 {offsets = [0, 0], sizes = [2, 128], strides = [1, 1]} : vector<2x512xf32> to vector<2x128xf32>
    %245 = arith.negf %244 : vector<2x128xf32>
    %246 = math.exp %245 : vector<2x128xf32>
    %cst_59 = arith.constant 1.000000e+00 : f32
    %247 = vector.broadcast %cst_59 : f32 to vector<2x128xf32>
    %248 = arith.addf %247, %246 : vector<2x128xf32>
    %249 = arith.divf %247, %248 : vector<2x128xf32>
    %250 = vector.extract_strided_slice %243 {offsets = [0, 128], sizes = [2, 128], strides = [1, 1]} : vector<2x512xf32> to vector<2x128xf32>
    %251 = arith.negf %250 : vector<2x128xf32>
    %252 = math.exp %251 : vector<2x128xf32>
    %cst_60 = arith.constant 1.000000e+00 : f32
    %253 = vector.broadcast %cst_60 : f32 to vector<2x128xf32>
    %254 = arith.addf %253, %252 : vector<2x128xf32>
    %255 = arith.divf %253, %254 : vector<2x128xf32>
    %256 = vector.extract_strided_slice %243 {offsets = [0, 256], sizes = [2, 128], strides = [1, 1]} : vector<2x512xf32> to vector<2x128xf32>
    %257 = math.tanh %256 : vector<2x128xf32>
    %258 = vector.extract_strided_slice %243 {offsets = [0, 384], sizes = [2, 128], strides = [1, 1]} : vector<2x512xf32> to vector<2x128xf32>
    %259 = arith.negf %258 : vector<2x128xf32>
    %260 = math.exp %259 : vector<2x128xf32>
    %cst_61 = arith.constant 1.000000e+00 : f32
    %261 = vector.broadcast %cst_61 : f32 to vector<2x128xf32>
    %262 = arith.addf %261, %260 : vector<2x128xf32>
    %263 = arith.divf %261, %262 : vector<2x128xf32>
    %264 = arith.mulf %255, %228 : vector<2x128xf32>
    %265 = arith.mulf %249, %257 : vector<2x128xf32>
    %266 = arith.addf %264, %265 : vector<2x128xf32>
    %267 = math.tanh %266 : vector<2x128xf32>
    %268 = arith.mulf %263, %267 : vector<2x128xf32>
    %269 = arith.index_cast %c6_i32 : i32 to index
    %c0_62 = arith.constant 0 : index
    %c0_63 = arith.constant 0 : index
    %270 = vector.load %arg11[%269, %c0_62, %c0_63] : memref<8x2x128xf32, #tpu.memory_space<vmem>>, vector<1x2x128xf32>
    %271 = vector.shape_cast %270 : vector<1x2x128xf32> to vector<2x128xf32>
    %272 = vector.shape_cast %268 : vector<2x128xf32> to vector<1x2x128xf32>
    tpu.vector_store %arg11[%269, %c0_62, %c0_63], %272 {strides = array<i32>} : memref<8x2x128xf32, #tpu.memory_space<vmem>>, vector<1x2x128xf32>,
    %c7_i32 = arith.constant 7 : i32
    %273 = arith.index_cast %c7_i32 : i32 to index
    %c0_64 = arith.constant 0 : index
    %c0_65 = arith.constant 0 : index
    %274 = vector.load %arg1[%273, %c0_64, %c0_65] : memref<8x2x512xbf16, #tpu.memory_space<vmem>>, vector<1x2x512xbf16>
    %275 = vector.shape_cast %274 : vector<1x2x512xbf16> to vector<2x512xbf16>
    %276 = arith.extf %275 : vector<2x512xbf16> to vector<2x512xf32>
    %277 = vector.broadcast %4 : vector<1x512xf32> to vector<2x512xf32>
    %278 = arith.addf %276, %277 : vector<2x512xf32>
    %279 = arith.truncf %268 : vector<2x128xf32> to vector<2x128xbf16>
    %cst_66 = arith.constant dense<0.000000e+00> : vector<2x512xf32>
    %280 = tpu.matmul %279, %3, %cst_66 {dimension_numbers = #tpu.dot_dimension_numbers<[1], [0], [0], [1], [0, 0, 1, 1], [], []>} : vector<2x128xbf16>, vector<128x512xbf16>, vector<2x512xf32> -> vector<2x512xf32>
    %281 = arith.addf %278, %280 : vector<2x512xf32>
    %282 = vector.extract_strided_slice %281 {offsets = [0, 0], sizes = [2, 128], strides = [1, 1]} : vector<2x512xf32> to vector<2x128xf32>
    %283 = arith.negf %282 : vector<2x128xf32>
    %284 = math.exp %283 : vector<2x128xf32>
    %cst_67 = arith.constant 1.000000e+00 : f32
    %285 = vector.broadcast %cst_67 : f32 to vector<2x128xf32>
    %286 = arith.addf %285, %284 : vector<2x128xf32>
    %287 = arith.divf %285, %286 : vector<2x128xf32>
    %288 = vector.extract_strided_slice %281 {offsets = [0, 128], sizes = [2, 128], strides = [1, 1]} : vector<2x512xf32> to vector<2x128xf32>
    %289 = arith.negf %288 : vector<2x128xf32>
    %290 = math.exp %289 : vector<2x128xf32>
    %cst_68 = arith.constant 1.000000e+00 : f32
    %291 = vector.broadcast %cst_68 : f32 to vector<2x128xf32>
    %292 = arith.addf %291, %290 : vector<2x128xf32>
    %293 = arith.divf %291, %292 : vector<2x128xf32>
    %294 = vector.extract_strided_slice %281 {offsets = [0, 256], sizes = [2, 128], strides = [1, 1]} : vector<2x512xf32> to vector<2x128xf32>
    %295 = math.tanh %294 : vector<2x128xf32>
    %296 = vector.extract_strided_slice %281 {offsets = [0, 384], sizes = [2, 128], strides = [1, 1]} : vector<2x512xf32> to vector<2x128xf32>
    %297 = arith.negf %296 : vector<2x128xf32>
    %298 = math.exp %297 : vector<2x128xf32>
    %cst_69 = arith.constant 1.000000e+00 : f32
    %299 = vector.broadcast %cst_69 : f32 to vector<2x128xf32>
    %300 = arith.addf %299, %298 : vector<2x128xf32>
    %301 = arith.divf %299, %300 : vector<2x128xf32>
    %302 = arith.mulf %293, %266 : vector<2x128xf32>
    %303 = arith.mulf %287, %295 : vector<2x128xf32>
    %304 = arith.addf %302, %303 : vector<2x128xf32>
    %305 = math.tanh %304 : vector<2x128xf32>
    %306 = arith.mulf %301, %305 : vector<2x128xf32>
    %307 = arith.index_cast %c7_i32 : i32 to index
    %c0_70 = arith.constant 0 : index
    %c0_71 = arith.constant 0 : index
    %308 = vector.load %arg11[%307, %c0_70, %c0_71] : memref<8x2x128xf32, #tpu.memory_space<vmem>>, vector<1x2x128xf32>
    %309 = vector.shape_cast %308 : vector<1x2x128xf32> to vector<2x128xf32>
    %310 = vector.shape_cast %306 : vector<2x128xf32> to vector<1x2x128xf32>
    tpu.vector_store %arg11[%307, %c0_70, %c0_71], %310 {strides = array<i32>} : memref<8x2x128xf32, #tpu.memory_space<vmem>>, vector<1x2x128xf32>,
    %c8_i32 = arith.constant 8 : i32
    %c0_72 = arith.constant 0 : index
    %c0_73 = arith.constant 0 : index
    %311 = vector.load %arg9[%c0_72, %c0_73] : memref<2x128xf32, #tpu.memory_space<vmem>>, vector<2x128xf32>
    tpu.vector_store %arg9[%c0_72, %c0_73], %306 {strides = array<i32>} : memref<2x128xf32, #tpu.memory_space<vmem>>, vector<2x128xf32>,
    %c0_74 = arith.constant 0 : index
    %c0_75 = arith.constant 0 : index
    %312 = vector.load %arg10[%c0_74, %c0_75] : memref<2x128xf32, #tpu.memory_space<vmem>>, vector<2x128xf32>
    tpu.vector_store %arg10[%c0_74, %c0_75], %304 {strides = array<i32>} : memref<2x128xf32, #tpu.memory_space<vmem>>, vector<2x128xf32>,
    %c0_76 = arith.constant 0 : index
    %c0_77 = arith.constant 0 : index
    %c0_78 = arith.constant 0 : index
    %313 = vector.load %arg11[%c0_76, %c0_77, %c0_78] : memref<8x2x128xf32, #tpu.memory_space<vmem>>, vector<8x2x128xf32>
    %c0_79 = arith.constant 0 : index
    %c0_80 = arith.constant 0 : index
    %314 = vector.load %arg4[%c0_79, %c0_80] : memref<1x128xf32, #tpu.memory_space<vmem>>, vector<1x128xf32>
    %315 = vector.shape_cast %314 : vector<1x128xf32> to vector<1x1x128xf32>
    %316 = vector.broadcast %315 : vector<1x1x128xf32> to vector<8x2x128xf32>
    %317 = arith.mulf %313, %316 : vector<8x2x128xf32>
    %cst_81 = arith.constant dense<0.000000e+00> : vector<8x2xf32>
    %318 = vector.multi_reduction <add>, %317, %cst_81 [2] : vector<8x2x128xf32> to vector<8x2xf32>
    %319 = vector.shape_cast %318 : vector<8x2xf32> to vector<8x2x1xf32>
    %c0_82 = arith.constant 0 : index
    %c0_83 = arith.constant 0 : index
    %320 = vector.load %arg5[%c0_82, %c0_83] : memref<1x1xf32, #tpu.memory_space<vmem>>, vector<1x1xf32>
    %321 = vector.shape_cast %320 : vector<1x1xf32> to vector<1x1x1xf32>
    %322 = vector.broadcast %321 : vector<1x1x1xf32> to vector<8x2x1xf32>
    %323 = arith.addf %319, %322 : vector<8x2x1xf32>
    %324 = arith.negf %323 : vector<8x2x1xf32>
    %325 = math.exp %324 : vector<8x2x1xf32>
    %cst_84 = arith.constant 1.000000e+00 : f32
    %326 = vector.broadcast %cst_84 : f32 to vector<8x2x1xf32>
    %327 = arith.addf %326, %325 : vector<8x2x1xf32>
    %328 = arith.divf %326, %327 : vector<8x2x1xf32>
    %c0_85 = arith.constant 0 : index
    %c0_86 = arith.constant 0 : index
    %c0_87 = arith.constant 0 : index
    %329 = vector.load %arg6[%c0_85, %c0_86, %c0_87] : memref<8x2x1xf32, #tpu.memory_space<vmem>>, vector<8x2x1xf32>
    tpu.vector_store %arg6[%c0_85, %c0_86, %c0_87], %328 {strides = array<i32>} : memref<8x2x1xf32, #tpu.memory_space<vmem>>, vector<8x2x1xf32>,
    %c0_i32_88 = arith.constant 0 : i32
    %330 = arith.cmpi eq, %arg0, %c0_i32_88 : i32
    %331 = arith.extui %330 : i1 to i32
    %c0_i32_89 = arith.constant 0 : i32
    %332 = arith.cmpi ne, %331, %c0_i32_89 : i32
    scf.if %332 {
      %c0_90 = arith.constant 0 : index
      %c0_91 = arith.constant 0 : index
      %333 = vector.load %arg7[%c0_90, %c0_91] : memref<2x128xf32, #tpu.memory_space<vmem>>, vector<2x128xf32>
      tpu.vector_store %arg7[%c0_90, %c0_91], %306 {strides = array<i32>} : memref<2x128xf32, #tpu.memory_space<vmem>>, vector<2x128xf32>,
      %c0_92 = arith.constant 0 : index
      %c0_93 = arith.constant 0 : index
      %334 = vector.load %arg8[%c0_92, %c0_93] : memref<2x128xf32, #tpu.memory_space<vmem>>, vector<2x128xf32>
      tpu.vector_store %arg8[%c0_92, %c0_93], %304 {strides = array<i32>} : memref<2x128xf32, #tpu.memory_space<vmem>>, vector<2x128xf32>,
    } else {
    }
    return
  }
  func.func @transform_0(%arg0: i32) -> (i32, i32, i32) {
    %c0_i32 = arith.constant 0 : i32
    %c0_i32_0 = arith.constant 0 : i32
    %c0_i32_1 = arith.constant 0 : i32
    return %arg0, %c0_i32, %c0_i32_0 : i32, i32, i32
  }
  func.func @transform_1(%arg0: i32) -> (i32, i32) {
    %c0_i32 = arith.constant 0 : i32
    %c0_i32_0 = arith.constant 0 : i32
    %c0_i32_1 = arith.constant 0 : i32
    return %c0_i32, %c0_i32_0 : i32, i32
  }
  func.func @transform_2(%arg0: i32) -> (i32, i32) {
    %c0_i32 = arith.constant 0 : i32
    %c0_i32_0 = arith.constant 0 : i32
    %c0_i32_1 = arith.constant 0 : i32
    return %c0_i32, %c0_i32_0 : i32, i32
  }
  func.func @transform_3(%arg0: i32) -> (i32, i32) {
    %c0_i32 = arith.constant 0 : i32
    %c0_i32_0 = arith.constant 0 : i32
    %c0_i32_1 = arith.constant 0 : i32
    return %c0_i32, %c0_i32_0 : i32, i32
  }
  func.func @transform_4(%arg0: i32) -> (i32, i32) {
    %c0_i32 = arith.constant 0 : i32
    %c0_i32_0 = arith.constant 0 : i32
    %c0_i32_1 = arith.constant 0 : i32
    return %c0_i32, %c0_i32_0 : i32, i32
  }
  func.func @transform_5(%arg0: i32) -> (i32, i32, i32) {
    %c0_i32 = arith.constant 0 : i32
    %c0_i32_0 = arith.constant 0 : i32
    %c0_i32_1 = arith.constant 0 : i32
    return %arg0, %c0_i32, %c0_i32_0 : i32, i32, i32
  }
  func.func @transform_6(%arg0: i32) -> (i32, i32) {
    %c0_i32 = arith.constant 0 : i32
    %c0_i32_0 = arith.constant 0 : i32
    %c0_i32_1 = arith.constant 0 : i32
    return %c0_i32, %c0_i32_0 : i32, i32
  }
  func.func @transform_7(%arg0: i32) -> (i32, i32) {
    %c0_i32 = arith.constant 0 : i32
    %c0_i32_0 = arith.constant 0 : i32
    %c0_i32_1 = arith.constant 0 : i32
    return %c0_i32, %c0_i32_0 : i32, i32
  }
}

</mosaic_0001>

<bundles_post_ra>
// kernel: sentiment_lstm_forward.2
= control target key start
LH: loop header
LB: loop body
LE: loop exit
PB: predicated region body
PF: predicated region fallthrough
CT: control target
= control target key end

     0   :  { %7 = vsyncpa [#allocation3], 0  ;;  %s463_s9 = smov [#allocation2]   ;;  %s509_s0 = inlined_call_operand.vmem [shape: bf16[16,128], index: 0, kind: input, shape index: {}]   ;;  %s510_s1 = inlined_call_operand.hbm [shape: bf16[128,512], index: 1, kind: input, shape index: {}]   ;;  %s511_s2 = inlined_call_operand.vmem [shape: bf16[16,512], index: 2, kind: output, shape index: {}]  }
   0x1   :  { %s15_s10 = sshll.u32 %s463_s9, 4  ;;  %s439_s13 = scalar_lea.hbm %s510_s1, 4096  ;;  %s16_s10 = int_to_ptr.vmem [resolvable:$true] %s15_s10 }
   0x2   :  { %p440_p0 = scmp.ne.s32.totalorder %s510_s1, %s439_s13  ;;  %p443_p1 = scmp.lt.u32.totalorder %s439_s13, %s510_s1 }
   0x4   :  { %p445_p2 = pnand %p443_p1, %p440_p0 }
   0x6   :  { %448 = shalt.err (!%p445_p2)
}
   0x7   :  { %s449_s18 = scalar_lea.vmem %s16_s10, 4096  ;;  %p454_p4 = scmp.lt.s32.totalorder %s16_s10, %s16_s10 }
   0x8   :  { %p450_p3 = scmp.ne.s32.totalorder %s16_s10, %s449_s18  ;;  %p455_p5 = scmp.lt.s32.totalorder %s449_s18, %s449_s18 }
   0xa   :  { %p456_p6 = por %p455_p5, %p454_p4 }
   0xc   :  { %p457_p7 = pnand %p456_p6, %p450_p3 }
   0xe   :  { %460 = shalt.err (!%p457_p7)
}
   0xf   :  { %s464_s19 = smov 256   ;;  %s465_s20 = smov 16  }
  0x10   :  { %21 = dma.hbm_to_vmem [thread:$0]  %s510_s1, 4096, %s16_s10, [#allocation3], %s464_s19, %s464_s19, %s465_s20  }
  0x11   :  { %461 = dma.done.wait [#allocation3], 4096  }
  0x12   :  { %462 = vsyncadd [#allocation3], 4294963200  ;;  %v466_v0 = vmov 0   ;;  %v390_v1 = vld [vmem:[#allocation2 + $0x4] ss:$16 sps:$4 sm:$0xff]  }
  0x13   :  { %258 = vmatprep.mubr.bf16.mxu0 %v466_v0  ;;  %301 = vmatprep.mubr.bf16.mxu1 %v466_v0  ;;  %v392_v2 = vld [vmem:[#allocation2 + $0xc] ss:$16 sps:$4 sm:$0xff]   ;;  %v394_v3 = vld [vmem:[#allocation2] ss:$16 sps:$4 sm:$0xff]   ;;  %v395_v4 = vld [vmem:[#allocation2 + $0x8] ss:$16 sps:$4 sm:$0xff]  }
  0x14   :  { %226 = vmatprep.subr.bf16.mxu0 %v390_v1  ;;  %269 = vmatprep.subr.bf16.mxu1 %v392_v2  ;;  %v396_v5 = vld [vmem:[#allocation2 + $0x24] ss:$16 sps:$4 sm:$0xff]   ;;  %v398_v6 = vld [vmem:[#allocation2 + $0x2c] ss:$16 sps:$4 sm:$0xff]   ;;  %v400_v7 = vld [vmem:[#allocation2 + $0x20] ss:$16 sps:$4 sm:$0xff]  }
  0x15   :  { %227 = vmatpush1.bf16.msra.mxu0 %v394_v3  ;;  %270 = vmatpush1.bf16.msra.mxu1 %v395_v4  ;;  %v401_v8 = vld [vmem:[#allocation2 + $0x28] ss:$16 sps:$4 sm:$0xff]   ;;  %v402_v9 = vld [vmem:[#allocation2 + $0x44] ss:$16 sps:$4 sm:$0xff]   ;;  %v404_v10 = vld [vmem:[#allocation2 + $0x4c] ss:$16 sps:$4 sm:$0xff]  }
  0x16   :  { %228 = vmatprep.subr.bf16.mxu0 %v396_v5  ;;  %271 = vmatprep.subr.bf16.mxu1 %v398_v6  ;;  %v406_v11 = vld [vmem:[#allocation2 + $0x40] ss:$16 sps:$4 sm:$0xff]   ;;  %v407_v12 = vld [vmem:[#allocation2 + $0x48] ss:$16 sps:$4 sm:$0xff]   ;;  %v408_v13 = vld [vmem:[#allocation2 + $0x64] ss:$16 sps:$4 sm:$0xff]  }
  0x17   :  { %v410_v14 = vld [vmem:[#allocation2 + $0x6c] ss:$16 sps:$4 sm:$0xff]   ;;  %v412_v15 = vld [vmem:[#allocation2 + $0x60] ss:$16 sps:$4 sm:$0xff]   ;;  %v413_v16 = vld [vmem:[#allocation2 + $0x68] ss:$16 sps:$4 sm:$0xff]  }
  0x18   :  { %v414_v17 = vld [vmem:[#allocation2 + $0x84] ss:$16 sps:$4 sm:$0xff]   ;;  %v416_v18 = vld [vmem:[#allocation2 + $0x8c] ss:$16 sps:$4 sm:$0xff]   ;;  %v418_v19 = vld [vmem:[#allocation2 + $0x80] ss:$16 sps:$4 sm:$0xff]  }
  0x19   :  { %229 = vmatpush1.bf16.msra.mxu0 %v400_v7  ;;  %272 = vmatpush1.bf16.msra.mxu1 %v401_v8  ;;  %v419_v20 = vld [vmem:[#allocation2 + $0x88] ss:$16 sps:$4 sm:$0xff]   ;;  %v420_v21 = vld [vmem:[#allocation2 + $0xa4] ss:$16 sps:$4 sm:$0xff]   ;;  %v422_v22 = vld [vmem:[#allocation2 + $0xac] ss:$16 sps:$4 sm:$0xff]  }
  0x1a   :  { %230 = vmatprep.subr.bf16.mxu0 %v402_v9  ;;  %273 = vmatprep.subr.bf16.mxu1 %v404_v10  ;;  %v424_v23 = vld [vmem:[#allocation2 + $0xa0] ss:$16 sps:$4 sm:$0xff]   ;;  %v425_v24 = vld [vmem:[#allocation2 + $0xa8] ss:$16 sps:$4 sm:$0xff]   ;;  %v426_v25 = vld [vmem:[#allocation2 + $0xc4] ss:$16 sps:$4 sm:$0xff]  }
  0x1b   :  { %v428_v26 = vld [vmem:[#allocation2 + $0xcc] ss:$16 sps:$4 sm:$0xff]   ;;  %v430_v27 = vld [vmem:[#allocation2 + $0xc0] ss:$16 sps:$4 sm:$0xff]   ;;  %v431_v28 = vld [vmem:[#allocation2 + $0xc8] ss:$16 sps:$4 sm:$0xff]  }
  0x1c   :  { %v432_v29 = vld [vmem:[#allocation2 + $0xe4] ss:$16 sps:$4 sm:$0xff]   ;;  %v434_v30 = vld [vmem:[#allocation2 + $0xec] ss:$16 sps:$4 sm:$0xff]   ;;  %v436_v31 = vld [vmem:[#allocation2 + $0xe0] ss:$16 sps:$4 sm:$0xff]  }
  0x1d   :  { %231 = vmatpush1.bf16.msra.mxu0 %v406_v11  ;;  %274 = vmatpush1.bf16.msra.mxu1 %v407_v12  ;;  %v437_v32 = vld [vmem:[#allocation2 + $0xe8] ss:$16 sps:$4 sm:$0xff]   ;;  %v438_v33 = vld [vmem:[%s509_s0] sm:$0xff]  }
  0x1e   :  { %232 = vmatprep.subr.bf16.mxu0 %v408_v13  ;;  %275 = vmatprep.subr.bf16.mxu1 %v410_v14 }
  0x21   :  { %233 = vmatpush1.bf16.msra.mxu0 %v412_v15  ;;  %276 = vmatpush1.bf16.msra.mxu1 %v413_v16 }
  0x22   :  { %234 = vmatprep.subr.bf16.mxu0 %v414_v17  ;;  %277 = vmatprep.subr.bf16.mxu1 %v416_v18 }
  0x25   :  { %235 = vmatpush1.bf16.msra.mxu0 %v418_v19  ;;  %278 = vmatpush1.bf16.msra.mxu1 %v419_v20 }
  0x26   :  { %236 = vmatprep.subr.bf16.mxu0 %v420_v21  ;;  %279 = vmatprep.subr.bf16.mxu1 %v422_v22 }
  0x29   :  { %237 = vmatpush1.bf16.msra.mxu0 %v424_v23  ;;  %280 = vmatpush1.bf16.msra.mxu1 %v425_v24 }
  0x2a   :  { %238 = vmatprep.subr.bf16.mxu0 %v426_v25  ;;  %281 = vmatprep.subr.bf16.mxu1 %v428_v26 }
  0x2d   :  { %239 = vmatpush1.bf16.msra.mxu0 %v430_v27  ;;  %282 = vmatpush1.bf16.msra.mxu1 %v431_v28 }
  0x2e   :  { %240 = vmatprep.subr.bf16.mxu0 %v432_v29  ;;  %283 = vmatprep.subr.bf16.mxu1 %v434_v30 }
  0x31   :  { %241 = vmatpush1.bf16.msra.mxu0 %v436_v31  ;;  %284 = vmatpush1.bf16.msra.mxu1 %v437_v32 }
  0x34   :  { %259 = vmatmul.mubr.bf16.vlgmr.msra.gmra.mrb[0].mxu0 %v438_v33  ;;  %302 = vmatmul.mubr.bf16.vlgmr.msra.gmra.mrb[0].mxu1 %v438_v33 }
 0x107   :  { %v260_v34 = vpop.f32.mrb[0].mxu0  ;;  %v303_v35 = vpop.f32.mrb[0].mxu1 }
 0x108   :  { %v262_v36 = vpop.f32.mrb[1].mxu0  ;;  %v305_v37 = vpop.f32.mrb[1].mxu1 }
 0x109   :  { %v382_v38 = vpack.c.bf16 %v262_v36, %v260_v34  ;;  %v383_v39 = vpack.c.bf16 %v305_v37, %v303_v35  ;;  %v264_v40 = vpop.f32.mrb[2].mxu0  ;;  %v307_v41 = vpop.f32.mrb[2].mxu1 }
 0x10a   :  { %v266_v42 = vpop.f32.mrb[3].mxu0  ;;  %v309_v43 = vpop.f32.mrb[3].mxu1 }
 0x10b   :  { %336 = vst [vmem:[%s511_s2] sm:$0xff] %v382_v38  ;;  %337 = vst [vmem:[%s511_s2 + $0x8] sm:$0xff] %v383_v39  ;;  %v384_v44 = vpack.c.bf16 %v266_v42, %v264_v40  ;;  %v385_v45 = vpack.c.bf16 %v309_v43, %v307_v41 }
 0x10d   :  { %338 = vst [vmem:[%s511_s2 + $0x10] sm:$0xff] %v384_v44  ;;  %339 = vst [vmem:[%s511_s2 + $0x18] sm:$0xff] %v385_v45 }
 0x10e   :  { %344 = vsyncpa [#allocation3], 1 }

// kernel: sentiment_lstm_forward.3
= control target key start
LH: loop header
LB: loop body
LE: loop exit
PB: predicated region body
PF: predicated region fallthrough
CT: control target
= control target key end

     0   :  { %v1861_v1 = vmov 0   ;;  %v1862_v2 = vmov 0.0   ;;  %v70_v37 = vlaneseq  ;;  %v1863_v39 = vmov 1983009808   ;;  %s2663_s2 = inlined_call_operand.vmem [shape: bf16[128,512], index: 2, kind: input, shape index: {}]   ;;  %s2664_s4 = inlined_call_operand.<no memory space> [shape: f32[1,1], index: 4, kind: input, shape index: {}]   ;;  %s2665_s1 = inlined_call_operand.vmem [shape: f32[1,512], index: 1, kind: input, shape index: {}]   ;;  %s2666_s0 = inlined_call_operand.vmem [shape: bf16[8,2,512], index: 0, kind: input, shape index: {}]   ;;  %s2667_s3 = inlined_call_operand.vmem [shape: f32[1,128], index: 3, kind: input, shape index: {}]   ;;  %s2668_s5 = inlined_call_operand.vmem [shape: f32[8,2,1], index: 5, kind: output, shape index: {0}]   ;;  %s2669_s7 = inlined_call_operand.vmem [shape: f32[2,128], index: 7, kind: output, shape index: {2}]   ;;  %s2670_s6 = inlined_call_operand.vmem [shape: f32[2,128], index: 6, kind: output, shape index: {1}]  }
   0x1   :  { %v1907_v0 = vld [vmem:[%s2663_s2 + $0x4] ss:$16 sps:$4 sm:$0xff]   ;;  %298 = vmatprep.mubr.bf16.mxu0 %v1861_v1  ;;  %339 = vmatprep.mubr.bf16.mxu1 %v1861_v1  ;;  %30 = vst [vmem:[#allocation2] sm:$0x3] %v1862_v2  ;;  %31 = vst [vmem:[#allocation3] sm:$0x3] %v1862_v2  ;;  %v13_v36 = vstv %s2664_s4  ;;  %v89_v40 = vunpack.c.l.s4 %v1863_v39 }
   0x2   :  { %v1914_v3 = vld [vmem:[%s2663_s2 + $0xc] ss:$16 sps:$4 sm:$0xff]   ;;  %266 = vmatprep.subr.bf16.mxu0 %v1907_v0  ;;  %v1920_v4 = vld [vmem:[%s2663_s2] ss:$16 sps:$4 sm:$0xff]   ;;  %v1925_v5 = vld [vmem:[%s2663_s2 + $0x8] ss:$16 sps:$4 sm:$0xff]  }
   0x3   :  { %307 = vmatprep.subr.bf16.mxu1 %v1914_v3  ;;  %v1931_v6 = vld [vmem:[%s2663_s2 + $0x24] ss:$16 sps:$4 sm:$0xff]   ;;  %267 = vmatpush1.bf16.msra.mxu0 %v1920_v4  ;;  %v1938_v7 = vld [vmem:[%s2663_s2 + $0x2c] ss:$16 sps:$4 sm:$0xff]   ;;  %v1943_v8 = vld [vmem:[%s2663_s2 + $0x20] ss:$16 sps:$4 sm:$0xff]   ;;  %v90_v46 = vunpack.c.0.s8 %v89_v40 }
   0x4   :  { %308 = vmatpush1.bf16.msra.mxu1 %v1925_v5  ;;  %268 = vmatprep.subr.bf16.mxu0 %v1931_v6  ;;  %v1949_v9 = vld [vmem:[%s2663_s2 + $0x28] ss:$16 sps:$4 sm:$0xff]   ;;  %v1955_v10 = vld [vmem:[%s2663_s2 + $0x44] ss:$16 sps:$4 sm:$0xff]   ;;  %v1960_v11 = vld [vmem:[%s2663_s2 + $0x4c] ss:$16 sps:$4 sm:$0xff]  }
   0x5   :  { %309 = vmatprep.subr.bf16.mxu1 %v1938_v7  ;;  %v1965_v12 = vld [vmem:[%s2663_s2 + $0x40] ss:$16 sps:$4 sm:$0xff]   ;;  %v1970_v13 = vld [vmem:[%s2663_s2 + $0x48] ss:$16 sps:$4 sm:$0xff]   ;;  %v1977_v14 = vld [vmem:[%s2663_s2 + $0x64] ss:$16 sps:$4 sm:$0xff]  }
   0x6   :  { %v1984_v15 = vld [vmem:[%s2663_s2 + $0x6c] ss:$16 sps:$4 sm:$0xff]   ;;  %v1989_v16 = vld [vmem:[%s2663_s2 + $0x60] ss:$16 sps:$4 sm:$0xff]   ;;  %v1996_v17 = vld [vmem:[%s2663_s2 + $0x68] ss:$16 sps:$4 sm:$0xff]  }
   0x7   :  { %269 = vmatpush1.bf16.msra.mxu0 %v1943_v8  ;;  %v2001_v18 = vld [vmem:[%s2663_s2 + $0x84] ss:$16 sps:$4 sm:$0xff]   ;;  %v2008_v19 = vld [vmem:[%s2663_s2 + $0x8c] ss:$16 sps:$4 sm:$0xff]   ;;  %v2013_v20 = vld [vmem:[%s2663_s2 + $0x80] ss:$16 sps:$4 sm:$0xff]  }
   0x8   :  { %310 = vmatpush1.bf16.msra.mxu1 %v1949_v9  ;;  %270 = vmatprep.subr.bf16.mxu0 %v1955_v10  ;;  %v2018_v21 = vld [vmem:[%s2663_s2 + $0x88] ss:$16 sps:$4 sm:$0xff]   ;;  %v2025_v22 = vld [vmem:[%s2663_s2 + $0xa4] ss:$16 sps:$4 sm:$0xff]   ;;  %v2032_v23 = vld [vmem:[%s2663_s2 + $0xac] ss:$16 sps:$4 sm:$0xff]  }
   0x9   :  { %311 = vmatprep.subr.bf16.mxu1 %v1960_v11  ;;  %v2039_v24 = vld [vmem:[%s2663_s2 + $0xa0] ss:$16 sps:$4 sm:$0xff]   ;;  %v2044_v25 = vld [vmem:[%s2663_s2 + $0xa8] ss:$16 sps:$4 sm:$0xff]   ;;  %v2051_v26 = vld [vmem:[%s2663_s2 + $0xc4] ss:$16 sps:$4 sm:$0xff]  }
   0xa   :  { %v2056_v27 = vld [vmem:[%s2663_s2 + $0xcc] ss:$16 sps:$4 sm:$0xff]   ;;  %v2063_v28 = vld [vmem:[%s2663_s2 + $0xc0] ss:$16 sps:$4 sm:$0xff]   ;;  %v2068_v29 = vld [vmem:[%s2663_s2 + $0xc8] ss:$16 sps:$4 sm:$0xff]  }
   0xb   :  { %271 = vmatpush1.bf16.msra.mxu0 %v1965_v12  ;;  %v2075_v30 = vld [vmem:[%s2663_s2 + $0xe4] ss:$16 sps:$4 sm:$0xff]   ;;  %v2080_v31 = vld [vmem:[%s2663_s2 + $0xec] ss:$16 sps:$4 sm:$0xff]   ;;  %v2087_v32 = vld [vmem:[%s2663_s2 + $0xe0] ss:$16 sps:$4 sm:$0xff]  }
   0xc   :  { %312 = vmatpush1.bf16.msra.mxu1 %v1970_v13  ;;  %272 = vmatprep.subr.bf16.mxu0 %v1977_v14  ;;  %v2092_v33 = vld [vmem:[%s2663_s2 + $0xe8] ss:$16 sps:$4 sm:$0xff]   ;;  %v65_v34 = vld [vmem:[#allocation2] sm:$0x3]  ;;  %14 = vst [vmem:[#allocation5] sm:$0x1] %v13_v36 }
   0xd   :  { %313 = vmatprep.subr.bf16.mxu1 %v1984_v15  ;;  %v105_v35 = vpack.c.bf16 %v65_v34, %v65_v34  ;;  %v71_v38 = vshrl.u32 %v70_v37, 7  ;;  %v64_v45 = vld [vmem:[%s2665_s1] sm:$0xf]  ;;  %vm1429_vm0 = vcmask 1041408   ;;  %vm1517_vm1 = vcmask 1024  }
   0xe   :  { %v67_v56 = vld [vmem:[%s2666_s0] sm:$0xf] }
   0xf   :  { %273 = vmatpush1.bf16.msra.mxu0 %v1989_v16  ;;  %v72_v41 = vsub.s32 0, %v71_v38  ;;  %v76_v42 = vsub.s32 1, %v71_v38  ;;  %v80_v43 = vsub.s32 2, %v71_v38  ;;  %v84_v44 = vsub.s32 3, %v71_v38 }
  0x10   :  { %314 = vmatpush1.bf16.msra.mxu1 %v1996_v17  ;;  %274 = vmatprep.subr.bf16.mxu0 %v2001_v18  ;;  %v2140_v51 = vsub.s32 %v90_v46, %v71_v38  ;;  %v68_v59 = vunpack.c.l.bf16 %v67_v56  ;;  %v66_v56 = vld [vmem:[#allocation3] sm:$0x3] }
  0x11   :  { %315 = vmatprep.subr.bf16.mxu1 %v2008_v19  ;;  %v73_v47 = vrot.slane %v64_v45, %v72_v41  ;;  %v77_v48 = vrot.slane %v64_v45, %v76_v42  ;;  %v81_v49 = vrot.slane %v64_v45, %v80_v43  ;;  %v85_v50 = vrot.slane %v64_v45, %v84_v44 }
  0x13   :  { %275 = vmatpush1.bf16.msra.mxu0 %v2013_v20  ;;  %v86_v52 = vcombine.low %v73_v47, %v77_v48  ;;  %v87_v53 = vcombine.low %v81_v49, %v85_v50 }
  0x14   :  { %316 = vmatpush1.bf16.msra.mxu1 %v2018_v21  ;;  %276 = vmatprep.subr.bf16.mxu0 %v2025_v22 }
  0x15   :  { %317 = vmatprep.subr.bf16.mxu1 %v2032_v23  ;;  %v94_v54 = vrot.slane %v86_v52, %v2140_v51  ;;  %v101_v55 = vrot.slane %v87_v53, %v2140_v51 }
  0x17   :  { %277 = vmatpush1.bf16.msra.mxu0 %v2039_v24  ;;  %v2147_v60 = vcombine.low %v94_v54, %v101_v55 }
  0x18   :  { %318 = vmatpush1.bf16.msra.mxu1 %v2044_v25  ;;  %278 = vmatprep.subr.bf16.mxu0 %v2051_v26 }
  0x19   :  { %319 = vmatprep.subr.bf16.mxu1 %v2056_v27  ;;  %v104_v39 = vadd.f32 %v2147_v60, %v68_v59 }
  0x1b   :  { %279 = vmatpush1.bf16.msra.mxu0 %v2063_v28 }
  0x1c   :  { %320 = vmatpush1.bf16.msra.mxu1 %v2068_v29  ;;  %280 = vmatprep.subr.bf16.mxu0 %v2075_v30 }
  0x1d   :  { %321 = vmatprep.subr.bf16.mxu1 %v2080_v31 }
  0x1f   :  { %281 = vmatpush1.bf16.msra.mxu0 %v2087_v32 }
  0x20   :  { %322 = vmatpush1.bf16.msra.mxu1 %v2092_v33  ;;  %408 = vmatprep.subr.bf16.mxu0 %v1907_v0 }
  0x21   :  { %449 = vmatprep.subr.bf16.mxu1 %v1914_v3 }
  0x22   :  { %299 = vmatmul.mubr.bf16.vlgmr.msra.gmra.mrb[0].mxu0 %v105_v35 }
  0x23   :  { %340 = vmatmul.mubr.bf16.vlgmr.msra.gmra.mrb[0].mxu1 %v105_v35  ;;  %409 = vmatpush1.bf16.msra.mxu0 %v1920_v4 }
  0x24   :  { %450 = vmatpush1.bf16.msra.mxu1 %v1925_v5  ;;  %410 = vmatprep.subr.bf16.mxu0 %v1931_v6 }
  0x25   :  { %451 = vmatprep.subr.bf16.mxu1 %v1938_v7  ;;  %440 = vmatprep.mubr.bf16.mxu0 %v1861_v1 }
  0x26   :  { %481 = vmatprep.mubr.bf16.mxu1 %v1861_v1 }
  0x27   :  { %411 = vmatpush1.bf16.msra.mxu0 %v1943_v8 }
  0x28   :  { %452 = vmatpush1.bf16.msra.mxu1 %v1949_v9  ;;  %412 = vmatprep.subr.bf16.mxu0 %v1955_v10 }
  0x29   :  { %453 = vmatprep.subr.bf16.mxu1 %v1960_v11 }
  0x2b   :  { %413 = vmatpush1.bf16.msra.mxu0 %v1965_v12 }
  0x2c   :  { %454 = vmatpush1.bf16.msra.mxu1 %v1970_v13  ;;  %414 = vmatprep.subr.bf16.mxu0 %v1977_v14 }
  0x2d   :  { %455 = vmatprep.subr.bf16.mxu1 %v1984_v15 }
  0x2f   :  { %415 = vmatpush1.bf16.msra.mxu0 %v1989_v16 }
  0x30   :  { %456 = vmatpush1.bf16.msra.mxu1 %v1996_v17  ;;  %416 = vmatprep.subr.bf16.mxu0 %v2001_v18 }
  0x31   :  { %457 = vmatprep.subr.bf16.mxu1 %v2008_v19 }
  0x33   :  { %417 = vmatpush1.bf16.msra.mxu0 %v2013_v20 }
  0x34   :  { %458 = vmatpush1.bf16.msra.mxu1 %v2018_v21  ;;  %418 = vmatprep.subr.bf16.mxu0 %v2025_v22 }
  0x35   :  { %459 = vmatprep.subr.bf16.mxu1 %v2032_v23 }
  0x37   :  { %419 = vmatpush1.bf16.msra.mxu0 %v2039_v24 }
  0x38   :  { %460 = vmatpush1.bf16.msra.mxu1 %v2044_v25  ;;  %420 = vmatprep.subr.bf16.mxu0 %v2051_v26 }
  0x39   :  { %461 = vmatprep.subr.bf16.mxu1 %v2056_v27 }
  0x3b   :  { %421 = vmatpush1.bf16.msra.mxu0 %v2063_v28 }
  0x3c   :  { %462 = vmatpush1.bf16.msra.mxu1 %v2068_v29  ;;  %422 = vmatprep.subr.bf16.mxu0 %v2075_v30 }
  0x3d   :  { %463 = vmatprep.subr.bf16.mxu1 %v2080_v31 }
  0x3f   :  { %423 = vmatpush1.bf16.msra.mxu0 %v2087_v32 }
  0x40   :  { %464 = vmatpush1.bf16.msra.mxu1 %v2092_v33  ;;  %551 = vmatprep.subr.bf16.mxu0 %v1907_v0 }
  0x41   :  { %592 = vmatprep.subr.bf16.mxu1 %v1914_v3 }
  0xf5   :  { %v300_v57 = vpop.f32.mrb[0].mxu0 }
  0xf6   :  { %v341_v58 = vpop.f32.mrb[0].mxu1  ;;  %v302_v61 = vpop.f32.mrb[1].mxu0 }
  0xf7   :  { %v343_v62 = vpop.f32.mrb[1].mxu1  ;;  %v352_v63 = vcombine.low %v300_v57, %v302_v61  ;;  %v304_v34 = vpop.f32.mrb[2].mxu0 }
  0xf8   :  { %v353_v2 = vcombine.low %v341_v58, %v343_v62  ;;  %v345_v35 = vpop.f32.mrb[2].mxu1  ;;  %v305_v36 = vpop.f32.mrb[3].mxu0 }
  0xf9   :  { %v346_v37 = vpop.f32.mrb[3].mxu1  ;;  %v360_v38 = vrot.slane %v352_v63, %v2140_v51 }
  0xfa   :  { %v367_v40 = vrot.slane %v353_v2, %v2140_v51  ;;  %v2162_v37 = vld [vmem:[%s2667_s3] ss:$0 sm:$0xff] }
  0xfc   :  { %v368_v41 = vcombine.low %v360_v38, %v367_v40 }
  0xfe   :  { %v370_v42 = vadd.f32 %v368_v41, %v104_v39  ;;  %v2196_v41 = vld [vmem:[#allocation5] ss:$0 sm:$0xff] }
 0x100   :  { %v1575_v43 = vmul.f32 -1.442695, %v370_v42  ;;  %v378_v44 = vrot.slane %v370_v42, 2  ;;  %v389_v46 = vrot.slane %v370_v42, 6  ;;  %v386_v49 = vrot.slane %v370_v42, 4 }
 0x102   :  { %1667 = vpow2.f32 %v1575_v43  ;;  %v1576_v45 = vmul.f32 -1.442695, %v378_v44  ;;  %v1577_v47 = vmul.f32 -1.442695, %v389_v46 }
 0x104   :  { %1669 = vpow2.f32 %v1576_v45 }
 0x105   :  { %1671 = vpow2.f32 %v1577_v47 }
 0x10c   :  { %v1668_v48 = vpop.eup %1667 }
 0x10d   :  { %v374_v50 = vadd.f32 1.0, %v1668_v48  ;;  %v2206_v48 = vld [vmem:[%s2666_s0 + $0x4] sm:$0xff]  }
 0x10e   :  { %v1670_v52 = vpop.eup %1669 }
 0x10f   :  { %1673 = vrcp.f32 %v374_v50  ;;  %v383_v53 = vadd.f32 1.0, %v1670_v52  ;;  %v1672_v54 = vpop.eup %1671  ;;  %v405_v52 = vunpack.c.l.bf16 %v2206_v48 }
 0x110   :  { %1675 = vtanh.f32 %v386_v49  ;;  %v394_v59 = vadd.f32 1.0, %v1672_v54 }
 0x111   :  { %1677 = vrcp.f32 %v383_v53 }
 0x112   :  { %1679 = vrcp.f32 %v394_v59 }
 0x119   :  { %v1674_v55 = vpop.eup %1673 }
 0x11a   :  { %v1676_v57 = vpop.eup %1675 }
 0x11b   :  { %v1678_v58 = vpop.eup %1677  ;;  %v398_v62 = vmul.f32 %v1676_v57, %v1674_v55 }
 0x11c   :  { %v397_v61 = vmul.f32 %v1678_v58, %v66_v56  ;;  %v1680_v2 = vpop.eup %1679 }
 0x11e   :  { %v2152_v63 = vadd.f32 %v398_v62, %v397_v61 }
 0x120   :  { %1681 = vtanh.f32 %v2152_v63 }
 0x12a   :  { %v1682_v34 = vpop.eup %1681 }
 0x12b   :  { %v401_v35 = vmul.f32 %v1682_v34, %v1680_v2  ;;  %v406_v2 = vadd.f32 %v405_v52, %v2147_v60 }
 0x12d   :  { %402 = vst [vmem:[#allocation4] sm:$0x3] %v401_v35  ;;  %v407_v36 = vpack.c.bf16 %v401_v35, %v401_v35 }
 0x12f   :  { %441 = vmatmul.mubr.bf16.vlgmr.msra.gmra.mrb[4].mxu0 %v407_v36  ;;  %482 = vmatmul.mubr.bf16.vlgmr.msra.gmra.mrb[4].mxu1 %v407_v36 }
 0x130   :  { %552 = vmatpush1.bf16.msra.mxu0 %v1920_v4  ;;  %593 = vmatpush1.bf16.msra.mxu1 %v1925_v5 }
 0x131   :  { %553 = vmatprep.subr.bf16.mxu0 %v1931_v6  ;;  %594 = vmatprep.subr.bf16.mxu1 %v1938_v7 }
 0x132   :  { %583 = vmatprep.mubr.bf16.mxu0 %v1861_v1  ;;  %624 = vmatprep.mubr.bf16.mxu1 %v1861_v1 }
 0x134   :  { %v1406_v38 = vld [vmem:[#allocation4] sm:$0x3]  ;;  %554 = vmatpush1.bf16.msra.mxu0 %v1943_v8  ;;  %595 = vmatpush1.bf16.msra.mxu1 %v1949_v9 }
 0x135   :  { %v1421_v39 = vmul.f32 %v2162_v37, %v1406_v38  ;;  %555 = vmatprep.subr.bf16.mxu0 %v1955_v10  ;;  %596 = vmatprep.subr.bf16.mxu1 %v1960_v11 }
 0x137   :  { %v1430_v40 = vsel %vm1429_vm0, %v1421_v39, 0.0 }
 0x138   :  { %1431 = vadd.xlane.f32.xlu0 %v1430_v40  ;;  %556 = vmatpush1.bf16.msra.mxu0 %v1965_v12 }
 0x139   :  { %597 = vmatpush1.bf16.msra.mxu1 %v1970_v13  ;;  %557 = vmatprep.subr.bf16.mxu0 %v1977_v14 }
 0x13a   :  { %598 = vmatprep.subr.bf16.mxu1 %v1984_v15 }
 0x13c   :  { %558 = vmatpush1.bf16.msra.mxu0 %v1989_v16 }
 0x13d   :  { %599 = vmatpush1.bf16.msra.mxu1 %v1996_v17  ;;  %559 = vmatprep.subr.bf16.mxu0 %v2001_v18 }
 0x13e   :  { %600 = vmatprep.subr.bf16.mxu1 %v2008_v19 }
 0x140   :  { %560 = vmatpush1.bf16.msra.mxu0 %v2013_v20 }
 0x141   :  { %601 = vmatpush1.bf16.msra.mxu1 %v2018_v21  ;;  %561 = vmatprep.subr.bf16.mxu0 %v2025_v22 }
 0x142   :  { %602 = vmatprep.subr.bf16.mxu1 %v2032_v23 }
 0x144   :  { %562 = vmatpush1.bf16.msra.mxu0 %v2039_v24 }
 0x145   :  { %603 = vmatpush1.bf16.msra.mxu1 %v2044_v25  ;;  %563 = vmatprep.subr.bf16.mxu0 %v2051_v26 }
 0x146   :  { %604 = vmatprep.subr.bf16.mxu1 %v2056_v27 }
 0x148   :  { %564 = vmatpush1.bf16.msra.mxu0 %v2063_v28 }
 0x149   :  { %605 = vmatpush1.bf16.msra.mxu1 %v2068_v29  ;;  %565 = vmatprep.subr.bf16.mxu0 %v2075_v30 }
 0x14a   :  { %606 = vmatprep.subr.bf16.mxu1 %v2080_v31 }
 0x14c   :  { %566 = vmatpush1.bf16.msra.mxu0 %v2087_v32 }
 0x14d   :  { %607 = vmatpush1.bf16.msra.mxu1 %v2092_v33  ;;  %694 = vmatprep.subr.bf16.mxu0 %v1907_v0 }
 0x14e   :  { %735 = vmatprep.subr.bf16.mxu1 %v1914_v3 }
 0x1c5   :  { %v1432_v42 = vpop.xlane.xlu0 %1431 }
 0x1c6   :  { %v1461_v43 = vadd.f32 %v2196_v41, %v1432_v42 }
 0x1c8   :  { %v1608_v44 = vmul.f32 -1.442695, %v1461_v43 }
 0x1ca   :  { %1683 = vpow2.f32 %v1608_v44 }
 0x1d4   :  { %v1684_v45 = vpop.eup %1683 }
 0x1d5   :  { %v1493_v46 = vadd.f32 1.0, %v1684_v45 }
 0x1d7   :  { %1685 = vrcp.f32 %v1493_v46 }
 0x1e1   :  { %v1686_v47 = vpop.eup %1685 }
 0x1e2   :  { %1518 = vst.msk [vmem:[%s2668_s5] sm:$0x3] %vm1517_vm1, %v1686_v47 }
 0x202   :  { %v442_v49 = vpop.f32.mrb[4].mxu0  ;;  %v483_v50 = vpop.f32.mrb[4].mxu1 }
 0x203   :  { %v444_v53 = vpop.f32.mrb[5].mxu0  ;;  %v485_v54 = vpop.f32.mrb[5].mxu1 }
 0x204   :  { %v494_v55 = vcombine.low %v442_v49, %v444_v53  ;;  %v495_v56 = vcombine.low %v483_v50, %v485_v54  ;;  %v446_v57 = vpop.f32.mrb[6].mxu0  ;;  %v487_v58 = vpop.f32.mrb[6].mxu1 }
 0x205   :  { %v447_v59 = vpop.f32.mrb[7].mxu0  ;;  %v488_v61 = vpop.f32.mrb[7].mxu1 }
 0x206   :  { %v502_v62 = vrot.slane %v494_v55, %v2140_v51  ;;  %v509_v34 = vrot.slane %v495_v56, %v2140_v51 }
 0x208   :  { %v510_v35 = vcombine.low %v502_v62, %v509_v34 }
 0x20a   :  { %v512_v36 = vadd.f32 %v510_v35, %v406_v2 }
 0x20c   :  { %v1579_v38 = vmul.f32 -1.442695, %v512_v36  ;;  %v520_v39 = vrot.slane %v512_v36, 2  ;;  %v531_v42 = vrot.slane %v512_v36, 6  ;;  %v528_v45 = vrot.slane %v512_v36, 4 }
 0x20e   :  { %1687 = vpow2.f32 %v1579_v38  ;;  %v1580_v40 = vmul.f32 -1.442695, %v520_v39  ;;  %v1581_v43 = vmul.f32 -1.442695, %v531_v42 }
 0x210   :  { %1689 = vpow2.f32 %v1580_v40 }
 0x211   :  { %1691 = vpow2.f32 %v1581_v43 }
 0x218   :  { %v1688_v44 = vpop.eup %1687 }
 0x219   :  { %v516_v46 = vadd.f32 1.0, %v1688_v44 }
 0x21a   :  { %v1690_v47 = vpop.eup %1689 }
 0x21b   :  { %1693 = vrcp.f32 %v516_v46  ;;  %v525_v49 = vadd.f32 1.0, %v1690_v47  ;;  %v1692_v50 = vpop.eup %1691  ;;  %v548_v46 = vunpack.c.h.bf16 %v2206_v48 }
 0x21c   :  { %1695 = vtanh.f32 %v528_v45  ;;  %v536_v55 = vadd.f32 1.0, %v1692_v50 }
 0x21d   :  { %1697 = vrcp.f32 %v525_v49 }
 0x21e   :  { %1699 = vrcp.f32 %v536_v55 }
 0x225   :  { %v1694_v52 = vpop.eup %1693 }
 0x226   :  { %v1696_v53 = vpop.eup %1695 }
 0x227   :  { %v1698_v54 = vpop.eup %1697  ;;  %v540_v57 = vmul.f32 %v1696_v53, %v1694_v52 }
 0x228   :  { %v539_v56 = vmul.f32 %v1698_v54, %v2152_v63  ;;  %v1700_v59 = vpop.eup %1699 }
 0x22a   :  { %v2213_v58 = vadd.f32 %v540_v57, %v539_v56 }
 0x22c   :  { %1701 = vtanh.f32 %v2213_v58 }
 0x236   :  { %v1702_v61 = vpop.eup %1701 }
 0x237   :  { %v543_v62 = vmul.f32 %v1702_v61, %v1700_v59  ;;  %v549_v59 = vadd.f32 %v548_v46, %v2147_v60 }
 0x239   :  { %545 = vst [vmem:[#allocation4 + $0x2] sm:$0x3] %v543_v62  ;;  %v550_v2 = vpack.c.bf16 %v543_v62, %v543_v62 }
 0x23b   :  { %584 = vmatmul.mubr.bf16.vlgmr.msra.gmra.mrb[8].mxu0 %v550_v2  ;;  %625 = vmatmul.mubr.bf16.vlgmr.msra.gmra.mrb[8].mxu1 %v550_v2 }
 0x23c   :  { %695 = vmatpush1.bf16.msra.mxu0 %v1920_v4  ;;  %736 = vmatpush1.bf16.msra.mxu1 %v1925_v5 }
 0x23d   :  { %696 = vmatprep.subr.bf16.mxu0 %v1931_v6  ;;  %737 = vmatprep.subr.bf16.mxu1 %v1938_v7 }
 0x23e   :  { %726 = vmatprep.mubr.bf16.mxu0 %v1861_v1  ;;  %767 = vmatprep.mubr.bf16.mxu1 %v1861_v1 }
 0x240   :  { %v1407_v63 = vld [vmem:[#allocation4 + $0x2] sm:$0x3]  ;;  %697 = vmatpush1.bf16.msra.mxu0 %v1943_v8  ;;  %738 = vmatpush1.bf16.msra.mxu1 %v1949_v9 }
 0x241   :  { %v1422_v34 = vmul.f32 %v2162_v37, %v1407_v63  ;;  %698 = vmatprep.subr.bf16.mxu0 %v1955_v10  ;;  %739 = vmatprep.subr.bf16.mxu1 %v1960_v11 }
 0x243   :  { %v1433_v35 = vsel %vm1429_vm0, %v1422_v34, 0.0 }
 0x244   :  { %1434 = vadd.xlane.f32.xlu0 %v1433_v35  ;;  %699 = vmatpush1.bf16.msra.mxu0 %v1965_v12 }
 0x245   :  { %740 = vmatpush1.bf16.msra.mxu1 %v1970_v13  ;;  %700 = vmatprep.subr.bf16.mxu0 %v1977_v14 }
 0x246   :  { %741 = vmatprep.subr.bf16.mxu1 %v1984_v15 }
 0x248   :  { %701 = vmatpush1.bf16.msra.mxu0 %v1989_v16 }
 0x249   :  { %742 = vmatpush1.bf16.msra.mxu1 %v1996_v17  ;;  %702 = vmatprep.subr.bf16.mxu0 %v2001_v18 }
 0x24a   :  { %743 = vmatprep.subr.bf16.mxu1 %v2008_v19 }
 0x24c   :  { %703 = vmatpush1.bf16.msra.mxu0 %v2013_v20 }
 0x24d   :  { %744 = vmatpush1.bf16.msra.mxu1 %v2018_v21  ;;  %704 = vmatprep.subr.bf16.mxu0 %v2025_v22 }
 0x24e   :  { %745 = vmatprep.subr.bf16.mxu1 %v2032_v23 }
 0x250   :  { %705 = vmatpush1.bf16.msra.mxu0 %v2039_v24 }
 0x251   :  { %746 = vmatpush1.bf16.msra.mxu1 %v2044_v25  ;;  %706 = vmatprep.subr.bf16.mxu0 %v2051_v26 }
 0x252   :  { %747 = vmatprep.subr.bf16.mxu1 %v2056_v27 }
 0x254   :  { %707 = vmatpush1.bf16.msra.mxu0 %v2063_v28 }
 0x255   :  { %748 = vmatpush1.bf16.msra.mxu1 %v2068_v29  ;;  %708 = vmatprep.subr.bf16.mxu0 %v2075_v30 }
 0x256   :  { %749 = vmatprep.subr.bf16.mxu1 %v2080_v31 }
 0x258   :  { %709 = vmatpush1.bf16.msra.mxu0 %v2087_v32 }
 0x259   :  { %750 = vmatpush1.bf16.msra.mxu1 %v2092_v33  ;;  %837 = vmatprep.subr.bf16.mxu0 %v1907_v0 }
 0x25a   :  { %878 = vmatprep.subr.bf16.mxu1 %v1914_v3 }
 0x2d1   :  { %v1435_v36 = vpop.xlane.xlu0 %1434 }
 0x2d2   :  { %v1462_v38 = vadd.f32 %v2196_v41, %v1435_v36 }
 0x2d4   :  { %v1609_v39 = vmul.f32 -1.442695, %v1462_v38 }
 0x2d6   :  { %1703 = vpow2.f32 %v1609_v39 }
 0x2e0   :  { %v1704_v40 = vpop.eup %1703 }
 0x2e1   :  { %v1494_v42 = vadd.f32 1.0, %v1704_v40 }
 0x2e3   :  { %1705 = vrcp.f32 %v1494_v42 }
 0x2ed   :  { %v1706_v43 = vpop.eup %1705 }
 0x2ee   :  { %1519 = vst.msk [vmem:[%s2668_s5 + $0x2] sm:$0x3] %vm1517_vm1, %v1706_v43 }
 0x30e   :  { %v585_v44 = vpop.f32.mrb[8].mxu0  ;;  %v626_v45 = vpop.f32.mrb[8].mxu1 }
 0x30f   :  { %v587_v47 = vpop.f32.mrb[9].mxu0  ;;  %v628_v49 = vpop.f32.mrb[9].mxu1 }
 0x310   :  { %v637_v50 = vcombine.low %v585_v44, %v587_v47  ;;  %v638_v52 = vcombine.low %v626_v45, %v628_v49  ;;  %v589_v53 = vpop.f32.mrb[10].mxu0  ;;  %v630_v54 = vpop.f32.mrb[10].mxu1 }
 0x311   :  { %v590_v55 = vpop.f32.mrb[11].mxu0  ;;  %v631_v56 = vpop.f32.mrb[11].mxu1 }
 0x312   :  { %v645_v57 = vrot.slane %v637_v50, %v2140_v51  ;;  %v652_v61 = vrot.slane %v638_v52, %v2140_v51 }
 0x314   :  { %v653_v62 = vcombine.low %v645_v57, %v652_v61 }
 0x316   :  { %v655_v2 = vadd.f32 %v653_v62, %v549_v59 }
 0x318   :  { %v1583_v63 = vmul.f32 -1.442695, %v655_v2  ;;  %v663_v34 = vrot.slane %v655_v2, 2  ;;  %v674_v35 = vrot.slane %v655_v2, 6  ;;  %v671_v39 = vrot.slane %v655_v2, 4 }
 0x31a   :  { %1707 = vpow2.f32 %v1583_v63  ;;  %v1584_v48 = vmul.f32 -1.442695, %v663_v34  ;;  %v1585_v36 = vmul.f32 -1.442695, %v674_v35 }
 0x31c   :  { %1709 = vpow2.f32 %v1584_v48 }
 0x31d   :  { %1711 = vpow2.f32 %v1585_v36 }
 0x324   :  { %v1708_v38 = vpop.eup %1707 }
 0x325   :  { %v659_v40 = vadd.f32 1.0, %v1708_v38 }
 0x326   :  { %v1710_v42 = vpop.eup %1709 }
 0x327   :  { %1713 = vrcp.f32 %v659_v40  ;;  %v668_v43 = vadd.f32 1.0, %v1710_v42  ;;  %v1712_v44 = vpop.eup %1711 }
 0x328   :  { %1715 = vtanh.f32 %v671_v39  ;;  %v679_v49 = vadd.f32 1.0, %v1712_v44 }
 0x329   :  { %1717 = vrcp.f32 %v668_v43 }
 0x32a   :  { %1719 = vrcp.f32 %v679_v49 }
 0x331   :  { %v1714_v45 = vpop.eup %1713 }
 0x332   :  { %v1716_v46 = vpop.eup %1715 }
 0x333   :  { %v1718_v47 = vpop.eup %1717  ;;  %v683_v52 = vmul.f32 %v1716_v46, %v1714_v45 }
 0x334   :  { %v682_v50 = vmul.f32 %v1718_v47, %v2213_v58  ;;  %v1720_v54 = vpop.eup %1719 }
 0x336   :  { %v2262_v53 = vadd.f32 %v683_v52, %v682_v50 }
 0x338   :  { %1721 = vtanh.f32 %v2262_v53 }
 0x342   :  { %v1722_v55 = vpop.eup %1721 }
 0x343   :  { %v686_v56 = vmul.f32 %v1722_v55, %v1720_v54 }
 0x345   :  { %688 = vst [vmem:[#allocation4 + $0x4] sm:$0x3] %v686_v56  ;;  %v693_v57 = vpack.c.bf16 %v686_v56, %v686_v56 }
 0x347   :  { %727 = vmatmul.mubr.bf16.vlgmr.msra.gmra.mrb[12].mxu0 %v693_v57  ;;  %768 = vmatmul.mubr.bf16.vlgmr.msra.gmra.mrb[12].mxu1 %v693_v57 }
 0x348   :  { %838 = vmatpush1.bf16.msra.mxu0 %v1920_v4  ;;  %879 = vmatpush1.bf16.msra.mxu1 %v1925_v5 }
 0x349   :  { %839 = vmatprep.subr.bf16.mxu0 %v1931_v6  ;;  %880 = vmatprep.subr.bf16.mxu1 %v1938_v7 }
 0x34a   :  { %869 = vmatprep.mubr.bf16.mxu0 %v1861_v1  ;;  %910 = vmatprep.mubr.bf16.mxu1 %v1861_v1 }
 0x34c   :  { %v1408_v58 = vld [vmem:[#allocation4 + $0x4] sm:$0x3]  ;;  %840 = vmatpush1.bf16.msra.mxu0 %v1943_v8  ;;  %881 = vmatpush1.bf16.msra.mxu1 %v1949_v9 }
 0x34d   :  { %v1423_v59 = vmul.f32 %v2162_v37, %v1408_v58  ;;  %841 = vmatprep.subr.bf16.mxu0 %v1955_v10  ;;  %882 = vmatprep.subr.bf16.mxu1 %v1960_v11 }
 0x34f   :  { %v1436_v61 = vsel %vm1429_vm0, %v1423_v59, 0.0 }
 0x350   :  { %1437 = vadd.xlane.f32.xlu1 %v1436_v61  ;;  %842 = vmatpush1.bf16.msra.mxu0 %v1965_v12 }
 0x351   :  { %883 = vmatpush1.bf16.msra.mxu1 %v1970_v13  ;;  %843 = vmatprep.subr.bf16.mxu0 %v1977_v14 }
 0x352   :  { %884 = vmatprep.subr.bf16.mxu1 %v1984_v15 }
 0x354   :  { %844 = vmatpush1.bf16.msra.mxu0 %v1989_v16 }
 0x355   :  { %885 = vmatpush1.bf16.msra.mxu1 %v1996_v17  ;;  %845 = vmatprep.subr.bf16.mxu0 %v2001_v18 }
 0x356   :  { %886 = vmatprep.subr.bf16.mxu1 %v2008_v19 }
 0x358   :  { %846 = vmatpush1.bf16.msra.mxu0 %v2013_v20 }
 0x359   :  { %887 = vmatpush1.bf16.msra.mxu1 %v2018_v21  ;;  %847 = vmatprep.subr.bf16.mxu0 %v2025_v22 }
 0x35a   :  { %888 = vmatprep.subr.bf16.mxu1 %v2032_v23 }
 0x35c   :  { %848 = vmatpush1.bf16.msra.mxu0 %v2039_v24 }
 0x35d   :  { %889 = vmatpush1.bf16.msra.mxu1 %v2044_v25  ;;  %849 = vmatprep.subr.bf16.mxu0 %v2051_v26 }
 0x35e   :  { %890 = vmatprep.subr.bf16.mxu1 %v2056_v27 }
 0x360   :  { %850 = vmatpush1.bf16.msra.mxu0 %v2063_v28 }
 0x361   :  { %891 = vmatpush1.bf16.msra.mxu1 %v2068_v29  ;;  %851 = vmatprep.subr.bf16.mxu0 %v2075_v30 }
 0x362   :  { %892 = vmatprep.subr.bf16.mxu1 %v2080_v31 }
 0x364   :  { %852 = vmatpush1.bf16.msra.mxu0 %v2087_v32 }
 0x365   :  { %893 = vmatpush1.bf16.msra.mxu1 %v2092_v33  ;;  %980 = vmatprep.subr.bf16.mxu0 %v1907_v0  ;;  %v2309_v0 = vld [vmem:[%s2666_s0 + $0xc] sm:$0xff]  }
 0x366   :  { %1021 = vmatprep.subr.bf16.mxu1 %v1914_v3  ;;  %v691_v38 = vunpack.c.l.bf16 %v2309_v0 }
 0x368   :  { %v692_v50 = vadd.f32 %v691_v38, %v2147_v60 }
 0x3dd   :  { %v1438_v62 = vpop.xlane.xlu1 %1437 }
 0x3de   :  { %v1463_v2 = vadd.f32 %v2196_v41, %v1438_v62 }
 0x3e0   :  { %v1610_v63 = vmul.f32 -1.442695, %v1463_v2 }
 0x3e2   :  { %1723 = vpow2.f32 %v1610_v63 }
 0x3ec   :  { %v1724_v34 = vpop.eup %1723 }
 0x3ed   :  { %v1495_v48 = vadd.f32 1.0, %v1724_v34 }
 0x3ef   :  { %1725 = vrcp.f32 %v1495_v48 }
 0x3f9   :  { %v1726_v35 = vpop.eup %1725 }
 0x3fa   :  { %1520 = vst.msk [vmem:[%s2668_s5 + $0x4] sm:$0x3] %vm1517_vm1, %v1726_v35 }
 0x41a   :  { %v728_v3 = vpop.f32.mrb[12].mxu0  ;;  %v769_v36 = vpop.f32.mrb[12].mxu1 }
 0x41b   :  { %v730_v39 = vpop.f32.mrb[13].mxu0  ;;  %v771_v40 = vpop.f32.mrb[13].mxu1 }
 0x41c   :  { %v780_v42 = vcombine.low %v728_v3, %v730_v39  ;;  %v781_v43 = vcombine.low %v769_v36, %v771_v40  ;;  %v732_v44 = vpop.f32.mrb[14].mxu0  ;;  %v773_v45 = vpop.f32.mrb[14].mxu1 }
 0x41d   :  { %v733_v46 = vpop.f32.mrb[15].mxu0  ;;  %v774_v47 = vpop.f32.mrb[15].mxu1 }
 0x41e   :  { %v788_v49 = vrot.slane %v780_v42, %v2140_v51  ;;  %v795_v52 = vrot.slane %v781_v43, %v2140_v51 }
 0x420   :  { %v796_v54 = vcombine.low %v788_v49, %v795_v52 }
 0x422   :  { %v798_v55 = vadd.f32 %v796_v54, %v692_v50 }
 0x424   :  { %v1587_v56 = vmul.f32 -1.442695, %v798_v55  ;;  %v806_v57 = vrot.slane %v798_v55, 2  ;;  %v817_v59 = vrot.slane %v798_v55, 6  ;;  %v814_v2 = vrot.slane %v798_v55, 4 }
 0x426   :  { %1727 = vpow2.f32 %v1587_v56  ;;  %v1588_v58 = vmul.f32 -1.442695, %v806_v57  ;;  %v1589_v61 = vmul.f32 -1.442695, %v817_v59 }
 0x428   :  { %1729 = vpow2.f32 %v1588_v58 }
 0x429   :  { %1731 = vpow2.f32 %v1589_v61 }
 0x430   :  { %v1728_v62 = vpop.eup %1727 }
 0x431   :  { %v802_v63 = vadd.f32 1.0, %v1728_v62 }
 0x432   :  { %v1730_v34 = vpop.eup %1729 }
 0x433   :  { %1733 = vrcp.f32 %v802_v63  ;;  %v811_v48 = vadd.f32 1.0, %v1730_v34  ;;  %v1732_v35 = vpop.eup %1731 }
 0x434   :  { %1735 = vtanh.f32 %v814_v2  ;;  %v822_v39 = vadd.f32 1.0, %v1732_v35 }
 0x435   :  { %1737 = vrcp.f32 %v811_v48 }
 0x436   :  { %1739 = vrcp.f32 %v822_v39  ;;  %v2393_v39 = vld [vmem:[%s2663_s2 + $0x24] ss:$16 sps:$4 sm:$0xff]  }
 0x43d   :  { %v1734_v3 = vpop.eup %1733 }
 0x43e   :  { %v1736_v36 = vpop.eup %1735 }
 0x43f   :  { %v1738_v38 = vpop.eup %1737  ;;  %v826_v42 = vmul.f32 %v1736_v36, %v1734_v3  ;;  %v2381_v36 = vld [vmem:[%s2663_s2] ss:$16 sps:$4 sm:$0xff]  }
 0x440   :  { %v825_v40 = vmul.f32 %v1738_v38, %v2262_v53  ;;  %v1740_v44 = vpop.eup %1739  ;;  %v2387_v38 = vld [vmem:[%s2663_s2 + $0x8] ss:$16 sps:$4 sm:$0xff]  }
 0x442   :  { %v2316_v43 = vadd.f32 %v826_v42, %v825_v40  ;;  %v2399_v40 = vld [vmem:[%s2663_s2 + $0x2c] ss:$16 sps:$4 sm:$0xff]  }
 0x444   :  { %1741 = vtanh.f32 %v2316_v43 }
 0x44e   :  { %v1742_v45 = vpop.eup %1741 }
 0x44f   :  { %v829_v46 = vmul.f32 %v1742_v45, %v1740_v44  ;;  %v2413_v44 = vld [vmem:[%s2663_s2 + $0x28] ss:$16 sps:$4 sm:$0xff]  }
 0x451   :  { %831 = vst [vmem:[#allocation4 + $0x6] sm:$0x3] %v829_v46  ;;  %v836_v47 = vpack.c.bf16 %v829_v46, %v829_v46  ;;  %v2420_v46 = vld [vmem:[%s2663_s2 + $0x44] ss:$16 sps:$4 sm:$0xff]  }
 0x453   :  { %870 = vmatmul.mubr.bf16.vlgmr.msra.gmra.mrb[16].mxu0 %v836_v47  ;;  %911 = vmatmul.mubr.bf16.vlgmr.msra.gmra.mrb[16].mxu1 %v836_v47  ;;  %v2426_v47 = vld [vmem:[%s2663_s2 + $0x4c] ss:$16 sps:$4 sm:$0xff]  }
 0x454   :  { %981 = vmatpush1.bf16.msra.mxu0 %v1920_v4  ;;  %1022 = vmatpush1.bf16.msra.mxu1 %v1925_v5  ;;  %v2356_v5 = vld [vmem:[%s2663_s2 + $0x4] ss:$16 sps:$4 sm:$0xff]  }
 0x455   :  { %982 = vmatprep.subr.bf16.mxu0 %v1931_v6  ;;  %1023 = vmatprep.subr.bf16.mxu1 %v1938_v7  ;;  %v2362_v6 = vld [vmem:[%s2663_s2 + $0xc] ss:$16 sps:$4 sm:$0xff]  }
 0x456   :  { %1012 = vmatprep.mubr.bf16.mxu0 %v1861_v1  ;;  %1053 = vmatprep.mubr.bf16.mxu1 %v1861_v1 }
 0x458   :  { %v1409_v53 = vld [vmem:[#allocation4 + $0x6] sm:$0x3]  ;;  %983 = vmatpush1.bf16.msra.mxu0 %v1943_v8  ;;  %1024 = vmatpush1.bf16.msra.mxu1 %v1949_v9 }
 0x459   :  { %v1424_v49 = vmul.f32 %v2162_v37, %v1409_v53  ;;  %984 = vmatprep.subr.bf16.mxu0 %v1955_v10  ;;  %1025 = vmatprep.subr.bf16.mxu1 %v1960_v11 }
 0x45b   :  { %v1439_v4 = vsel %vm1429_vm0, %v1424_v49, 0.0  ;;  %v2433_v49 = vld [vmem:[%s2663_s2 + $0x40] ss:$16 sps:$4 sm:$0xff]  }
 0x45c   :  { %1440 = vadd.xlane.f32.xlu1 %v1439_v4  ;;  %985 = vmatpush1.bf16.msra.mxu0 %v1965_v12  ;;  %v2439_v4 = vld [vmem:[%s2663_s2 + $0x48] ss:$16 sps:$4 sm:$0xff]  }
 0x45d   :  { %1026 = vmatpush1.bf16.msra.mxu1 %v1970_v13  ;;  %986 = vmatprep.subr.bf16.mxu0 %v1977_v14 }
 0x45e   :  { %1027 = vmatprep.subr.bf16.mxu1 %v1984_v15  ;;  %v834_v15 = vunpack.c.h.bf16 %v2309_v0 }
 0x460   :  { %987 = vmatpush1.bf16.msra.mxu0 %v1989_v16 }
 0x461   :  { %1028 = vmatpush1.bf16.msra.mxu1 %v1996_v17  ;;  %988 = vmatprep.subr.bf16.mxu0 %v2001_v18 }
 0x462   :  { %1029 = vmatprep.subr.bf16.mxu1 %v2008_v19 }
 0x464   :  { %989 = vmatpush1.bf16.msra.mxu0 %v2013_v20 }
 0x465   :  { %1030 = vmatpush1.bf16.msra.mxu1 %v2018_v21  ;;  %990 = vmatprep.subr.bf16.mxu0 %v2025_v22 }
 0x466   :  { %1031 = vmatprep.subr.bf16.mxu1 %v2032_v23 }
 0x468   :  { %991 = vmatpush1.bf16.msra.mxu0 %v2039_v24 }
 0x469   :  { %1032 = vmatpush1.bf16.msra.mxu1 %v2044_v25  ;;  %992 = vmatprep.subr.bf16.mxu0 %v2051_v26  ;;  %v835_v25 = vadd.f32 %v834_v15, %v2147_v60  ;;  %v2493_v15 = vld [vmem:[%s2663_s2 + $0xa4] ss:$16 sps:$4 sm:$0xff]  }
 0x46a   :  { %1033 = vmatprep.subr.bf16.mxu1 %v2056_v27 }
 0x46c   :  { %993 = vmatpush1.bf16.msra.mxu0 %v2063_v28 }
 0x46d   :  { %1034 = vmatpush1.bf16.msra.mxu1 %v2068_v29  ;;  %994 = vmatprep.subr.bf16.mxu0 %v2075_v30 }
 0x46e   :  { %1035 = vmatprep.subr.bf16.mxu1 %v2080_v31 }
 0x470   :  { %995 = vmatpush1.bf16.msra.mxu0 %v2087_v32 }
 0x471   :  { %1036 = vmatpush1.bf16.msra.mxu1 %v2092_v33  ;;  %1123 = vmatprep.subr.bf16.mxu0 %v2356_v5 }
 0x472   :  { %1164 = vmatprep.subr.bf16.mxu1 %v2362_v6 }
 0x4e9   :  { %v1441_v7 = vpop.xlane.xlu1 %1440 }
 0x4ea   :  { %v1464_v8 = vadd.f32 %v2196_v41, %v1441_v7  ;;  %v2445_v7 = vld [vmem:[%s2663_s2 + $0x64] ss:$16 sps:$4 sm:$0xff]  }
 0x4ec   :  { %v1611_v9 = vmul.f32 -1.442695, %v1464_v8  ;;  %v2451_v8 = vld [vmem:[%s2663_s2 + $0x6c] ss:$16 sps:$4 sm:$0xff]  }
 0x4ee   :  { %1743 = vpow2.f32 %v1611_v9  ;;  %v2457_v9 = vld [vmem:[%s2663_s2 + $0x60] ss:$16 sps:$4 sm:$0xff]  }
 0x4f8   :  { %v1744_v10 = vpop.eup %1743 }
 0x4f9   :  { %v1496_v11 = vadd.f32 1.0, %v1744_v10  ;;  %v2463_v10 = vld [vmem:[%s2663_s2 + $0x68] ss:$16 sps:$4 sm:$0xff]  }
 0x4fb   :  { %1745 = vrcp.f32 %v1496_v11  ;;  %v2469_v11 = vld [vmem:[%s2663_s2 + $0x84] ss:$16 sps:$4 sm:$0xff]  }
 0x505   :  { %v1746_v12 = vpop.eup %1745 }
 0x506   :  { %1521 = vst.msk [vmem:[%s2668_s5 + $0x6] sm:$0x3] %vm1517_vm1, %v1746_v12  ;;  %v2475_v12 = vld [vmem:[%s2663_s2 + $0x8c] ss:$16 sps:$4 sm:$0xff]  }
 0x526   :  { %v871_v13 = vpop.f32.mrb[16].mxu0  ;;  %v912_v14 = vpop.f32.mrb[16].mxu1 }
 0x527   :  { %v873_v16 = vpop.f32.mrb[17].mxu0  ;;  %v914_v17 = vpop.f32.mrb[17].mxu1 }
 0x528   :  { %v923_v18 = vcombine.low %v871_v13, %v873_v16  ;;  %v924_v19 = vcombine.low %v912_v14, %v914_v17  ;;  %v875_v20 = vpop.f32.mrb[18].mxu0  ;;  %v916_v21 = vpop.f32.mrb[18].mxu1  ;;  %v2481_v13 = vld [vmem:[%s2663_s2 + $0x80] ss:$16 sps:$4 sm:$0xff]   ;;  %v2487_v14 = vld [vmem:[%s2663_s2 + $0x88] ss:$16 sps:$4 sm:$0xff]  }
 0x529   :  { %v876_v22 = vpop.f32.mrb[19].mxu0  ;;  %v917_v23 = vpop.f32.mrb[19].mxu1  ;;  %v2499_v16 = vld [vmem:[%s2663_s2 + $0xac] ss:$16 sps:$4 sm:$0xff]   ;;  %v2505_v17 = vld [vmem:[%s2663_s2 + $0xa0] ss:$16 sps:$4 sm:$0xff]  }
 0x52a   :  { %v931_v24 = vrot.slane %v923_v18, %v2140_v51  ;;  %v938_v26 = vrot.slane %v924_v19, %v2140_v51  ;;  %v2511_v18 = vld [vmem:[%s2663_s2 + $0xa8] ss:$16 sps:$4 sm:$0xff]   ;;  %v2517_v19 = vld [vmem:[%s2663_s2 + $0xc4] ss:$16 sps:$4 sm:$0xff]   ;;  %v2523_v20 = vld [vmem:[%s2663_s2 + $0xcc] ss:$16 sps:$4 sm:$0xff]  }
 0x52b   :  { %v2529_v21 = vld [vmem:[%s2663_s2 + $0xc0] ss:$16 sps:$4 sm:$0xff]   ;;  %v2535_v22 = vld [vmem:[%s2663_s2 + $0xc8] ss:$16 sps:$4 sm:$0xff]   ;;  %v2541_v23 = vld [vmem:[%s2663_s2 + $0xe4] ss:$16 sps:$4 sm:$0xff]  }
 0x52c   :  { %v939_v27 = vcombine.low %v931_v24, %v938_v26  ;;  %v2547_v24 = vld [vmem:[%s2663_s2 + $0xec] ss:$16 sps:$4 sm:$0xff]   ;;  %v2559_v26 = vld [vmem:[%s2663_s2 + $0xe8] ss:$16 sps:$4 sm:$0xff]  }
 0x52e   :  { %v941_v28 = vadd.f32 %v939_v27, %v835_v25  ;;  %v2553_v25 = vld [vmem:[%s2663_s2 + $0xe0] ss:$16 sps:$4 sm:$0xff]  }
 0x530   :  { %v1591_v29 = vmul.f32 -1.442695, %v941_v28  ;;  %v949_v30 = vrot.slane %v941_v28, 2  ;;  %v960_v32 = vrot.slane %v941_v28, 6  ;;  %v957_v50 = vrot.slane %v941_v28, 4 }
 0x532   :  { %1747 = vpow2.f32 %v1591_v29  ;;  %v1592_v31 = vmul.f32 -1.442695, %v949_v30  ;;  %v1593_v33 = vmul.f32 -1.442695, %v960_v32 }
 0x534   :  { %1749 = vpow2.f32 %v1592_v31 }
 0x535   :  { %1751 = vpow2.f32 %v1593_v33 }
 0x53c   :  { %v1748_v0 = vpop.eup %1747 }
 0x53d   :  { %v945_v52 = vadd.f32 1.0, %v1748_v0 }
 0x53e   :  { %v1750_v54 = vpop.eup %1749 }
 0x53f   :  { %1753 = vrcp.f32 %v945_v52  ;;  %v954_v55 = vadd.f32 1.0, %v1750_v54  ;;  %v1752_v56 = vpop.eup %1751 }
 0x540   :  { %1755 = vtanh.f32 %v957_v50  ;;  %v965_v61 = vadd.f32 1.0, %v1752_v56 }
 0x541   :  { %1757 = vrcp.f32 %v954_v55 }
 0x542   :  { %1759 = vrcp.f32 %v965_v61 }
 0x549   :  { %v1754_v57 = vpop.eup %1753 }
 0x54a   :  { %v1756_v58 = vpop.eup %1755 }
 0x54b   :  { %v1758_v59 = vpop.eup %1757  ;;  %v969_v2 = vmul.f32 %v1756_v58, %v1754_v57 }
 0x54c   :  { %v968_v62 = vmul.f32 %v1758_v59, %v2316_v43  ;;  %v1760_v34 = vpop.eup %1759  ;;  %v2407_v43 = vld [vmem:[%s2663_s2 + $0x20] ss:$16 sps:$4 sm:$0xff]  }
 0x54e   :  { %v2375_v63 = vadd.f32 %v969_v2, %v968_v62 }
 0x550   :  { %1761 = vtanh.f32 %v2375_v63 }
 0x55a   :  { %v1762_v48 = vpop.eup %1761 }
 0x55b   :  { %v972_v35 = vmul.f32 %v1762_v48, %v1760_v34 }
 0x55d   :  { %974 = vst [vmem:[#allocation4 + $0x8] sm:$0x3] %v972_v35  ;;  %v979_v3 = vpack.c.bf16 %v972_v35, %v972_v35 }
 0x55f   :  { %1013 = vmatmul.mubr.bf16.vlgmr.msra.gmra.mrb[20].mxu0 %v979_v3  ;;  %1054 = vmatmul.mubr.bf16.vlgmr.msra.gmra.mrb[20].mxu1 %v979_v3 }
 0x560   :  { %1124 = vmatpush1.bf16.msra.mxu0 %v2381_v36  ;;  %1165 = vmatpush1.bf16.msra.mxu1 %v2387_v38 }
 0x561   :  { %1125 = vmatprep.subr.bf16.mxu0 %v2393_v39  ;;  %1166 = vmatprep.subr.bf16.mxu1 %v2399_v40 }
 0x562   :  { %1155 = vmatprep.mubr.bf16.mxu0 %v1861_v1  ;;  %1196 = vmatprep.mubr.bf16.mxu1 %v1861_v1 }
 0x564   :  { %v1410_v42 = vld [vmem:[#allocation4 + $0x8] sm:$0x3]  ;;  %1126 = vmatpush1.bf16.msra.mxu0 %v2407_v43  ;;  %1167 = vmatpush1.bf16.msra.mxu1 %v2413_v44 }
 0x565   :  { %v1425_v45 = vmul.f32 %v2162_v37, %v1410_v42  ;;  %1127 = vmatprep.subr.bf16.mxu0 %v2420_v46  ;;  %1168 = vmatprep.subr.bf16.mxu1 %v2426_v47 }
 0x567   :  { %v1442_v53 = vsel %vm1429_vm0, %v1425_v45, 0.0 }
 0x568   :  { %1443 = vadd.xlane.f32.xlu0 %v1442_v53  ;;  %1128 = vmatpush1.bf16.msra.mxu0 %v2433_v49 }
 0x569   :  { %1169 = vmatpush1.bf16.msra.mxu1 %v2439_v4  ;;  %1129 = vmatprep.subr.bf16.mxu0 %v2445_v7 }
 0x56a   :  { %1170 = vmatprep.subr.bf16.mxu1 %v2451_v8 }
 0x56c   :  { %1130 = vmatpush1.bf16.msra.mxu0 %v2457_v9 }
 0x56d   :  { %1171 = vmatpush1.bf16.msra.mxu1 %v2463_v10  ;;  %1131 = vmatprep.subr.bf16.mxu0 %v2469_v11 }
 0x56e   :  { %1172 = vmatprep.subr.bf16.mxu1 %v2475_v12 }
 0x570   :  { %1132 = vmatpush1.bf16.msra.mxu0 %v2481_v13 }
 0x571   :  { %1173 = vmatpush1.bf16.msra.mxu1 %v2487_v14  ;;  %1133 = vmatprep.subr.bf16.mxu0 %v2493_v15 }
 0x572   :  { %1174 = vmatprep.subr.bf16.mxu1 %v2499_v16 }
 0x574   :  { %1134 = vmatpush1.bf16.msra.mxu0 %v2505_v17 }
 0x575   :  { %1175 = vmatpush1.bf16.msra.mxu1 %v2511_v18  ;;  %1135 = vmatprep.subr.bf16.mxu0 %v2517_v19 }
 0x576   :  { %1176 = vmatprep.subr.bf16.mxu1 %v2523_v20 }
 0x578   :  { %1136 = vmatpush1.bf16.msra.mxu0 %v2529_v21 }
 0x579   :  { %1177 = vmatpush1.bf16.msra.mxu1 %v2535_v22  ;;  %1137 = vmatprep.subr.bf16.mxu0 %v2541_v23 }
 0x57a   :  { %1178 = vmatprep.subr.bf16.mxu1 %v2547_v24 }
 0x57c   :  { %1138 = vmatpush1.bf16.msra.mxu0 %v2553_v25 }
 0x57d   :  { %1179 = vmatpush1.bf16.msra.mxu1 %v2559_v26  ;;  %1266 = vmatprep.subr.bf16.mxu0 %v2356_v5  ;;  %v2572_v5 = vld [vmem:[%s2666_s0 + $0x14] sm:$0xff]  }
 0x57e   :  { %1307 = vmatprep.subr.bf16.mxu1 %v2362_v6  ;;  %v977_v0 = vunpack.c.l.bf16 %v2572_v5 }
 0x580   :  { %v978_v62 = vadd.f32 %v977_v0, %v2147_v60 }
 0x5f5   :  { %v1444_v27 = vpop.xlane.xlu0 %1443 }
 0x5f6   :  { %v1465_v28 = vadd.f32 %v2196_v41, %v1444_v27 }
 0x5f8   :  { %v1612_v29 = vmul.f32 -1.442695, %v1465_v28 }
 0x5fa   :  { %1763 = vpow2.f32 %v1612_v29 }
 0x604   :  { %v1764_v30 = vpop.eup %1763 }
 0x605   :  { %v1497_v31 = vadd.f32 1.0, %v1764_v30 }
 0x607   :  { %1765 = vrcp.f32 %v1497_v31 }
 0x611   :  { %v1766_v32 = vpop.eup %1765 }
 0x612   :  { %1522 = vst.msk [vmem:[%s2668_s5 + $0x8] sm:$0x3] %vm1517_vm1, %v1766_v32 }
 0x632   :  { %v1014_v6 = vpop.f32.mrb[20].mxu0  ;;  %v1055_v33 = vpop.f32.mrb[20].mxu1 }
 0x633   :  { %v1016_v50 = vpop.f32.mrb[21].mxu0  ;;  %v1057_v52 = vpop.f32.mrb[21].mxu1 }
 0x634   :  { %v1066_v54 = vcombine.low %v1014_v6, %v1016_v50  ;;  %v1067_v55 = vcombine.low %v1055_v33, %v1057_v52  ;;  %v1018_v56 = vpop.f32.mrb[22].mxu0  ;;  %v1059_v57 = vpop.f32.mrb[22].mxu1 }
 0x635   :  { %v1019_v58 = vpop.f32.mrb[23].mxu0  ;;  %v1060_v59 = vpop.f32.mrb[23].mxu1 }
 0x636   :  { %v1074_v61 = vrot.slane %v1066_v54, %v2140_v51  ;;  %v1081_v2 = vrot.slane %v1067_v55, %v2140_v51 }
 0x638   :  { %v1082_v34 = vcombine.low %v1074_v61, %v1081_v2 }
 0x63a   :  { %v1084_v48 = vadd.f32 %v1082_v34, %v978_v62 }
 0x63c   :  { %v1595_v35 = vmul.f32 -1.442695, %v1084_v48  ;;  %v1092_v3 = vrot.slane %v1084_v48, 2  ;;  %v1103_v45 = vrot.slane %v1084_v48, 6  ;;  %v1100_v28 = vrot.slane %v1084_v48, 4 }
 0x63e   :  { %1767 = vpow2.f32 %v1595_v35  ;;  %v1596_v42 = vmul.f32 -1.442695, %v1092_v3  ;;  %v1597_v53 = vmul.f32 -1.442695, %v1103_v45 }
 0x640   :  { %1769 = vpow2.f32 %v1596_v42 }
 0x641   :  { %1771 = vpow2.f32 %v1597_v53 }
 0x648   :  { %v1768_v27 = vpop.eup %1767 }
 0x649   :  { %v1088_v29 = vadd.f32 1.0, %v1768_v27 }
 0x64a   :  { %v1770_v30 = vpop.eup %1769 }
 0x64b   :  { %1773 = vrcp.f32 %v1088_v29  ;;  %v1097_v31 = vadd.f32 1.0, %v1770_v30  ;;  %v1772_v32 = vpop.eup %1771  ;;  %v2632_v30 = vld [vmem:[%s2667_s3] ss:$0 sm:$0xff] }
 0x64c   :  { %1775 = vtanh.f32 %v1100_v28  ;;  %v1108_v50 = vadd.f32 1.0, %v1772_v32 }
 0x64d   :  { %1777 = vrcp.f32 %v1097_v31 }
 0x64e   :  { %1779 = vrcp.f32 %v1108_v50 }
 0x655   :  { %v1774_v6 = vpop.eup %1773 }
 0x656   :  { %v1776_v33 = vpop.eup %1775 }
 0x657   :  { %v1778_v0 = vpop.eup %1777  ;;  %v1112_v54 = vmul.f32 %v1776_v33, %v1774_v6  ;;  %v2636_v33 = vld [vmem:[#allocation5] ss:$0 sm:$0xff] }
 0x658   :  { %v1111_v52 = vmul.f32 %v1778_v0, %v2375_v63  ;;  %v1780_v56 = vpop.eup %1779 }
 0x65a   :  { %v2579_v55 = vadd.f32 %v1112_v54, %v1111_v52 }
 0x65c   :  { %1781 = vtanh.f32 %v2579_v55 }
 0x666   :  { %v1782_v57 = vpop.eup %1781 }
 0x667   :  { %v1115_v58 = vmul.f32 %v1782_v57, %v1780_v56  ;;  %v1602_v56 = vld [vmem:[%s2666_s0 + $0x1c] sm:$0xf] }
 0x669   :  { %1117 = vst [vmem:[#allocation4 + $0xa] sm:$0x3] %v1115_v58  ;;  %v1122_v59 = vpack.c.bf16 %v1115_v58, %v1115_v58 }
 0x66b   :  { %1156 = vmatmul.mubr.bf16.vlgmr.msra.gmra.mrb[24].mxu0 %v1122_v59  ;;  %1197 = vmatmul.mubr.bf16.vlgmr.msra.gmra.mrb[24].mxu1 %v1122_v59  ;;  %v1263_v59 = vunpack.c.l.bf16 %v1602_v56 }
 0x66c   :  { %1267 = vmatpush1.bf16.msra.mxu0 %v2381_v36  ;;  %1308 = vmatpush1.bf16.msra.mxu1 %v2387_v38 }
 0x66d   :  { %1268 = vmatprep.subr.bf16.mxu0 %v2393_v39  ;;  %1309 = vmatprep.subr.bf16.mxu1 %v2399_v40 }
 0x66e   :  { %1298 = vmatprep.mubr.bf16.mxu0 %v1861_v1  ;;  %1339 = vmatprep.mubr.bf16.mxu1 %v1861_v1 }
 0x670   :  { %v1411_v63 = vld [vmem:[#allocation4 + $0xa] sm:$0x3]  ;;  %1269 = vmatpush1.bf16.msra.mxu0 %v2407_v43  ;;  %1310 = vmatpush1.bf16.msra.mxu1 %v2413_v44 }
 0x671   :  { %v1426_v61 = vmul.f32 %v2162_v37, %v1411_v63  ;;  %1270 = vmatprep.subr.bf16.mxu0 %v2420_v46  ;;  %1311 = vmatprep.subr.bf16.mxu1 %v2426_v47  ;;  %v1120_v47 = vunpack.c.h.bf16 %v2572_v5 }
 0x673   :  { %v1445_v36 = vsel %vm1429_vm0, %v1426_v61, 0.0 }
 0x674   :  { %1446 = vadd.xlane.f32.xlu1 %v1445_v36  ;;  %1271 = vmatpush1.bf16.msra.mxu0 %v2433_v49 }
 0x675   :  { %1312 = vmatpush1.bf16.msra.mxu1 %v2439_v4  ;;  %1272 = vmatprep.subr.bf16.mxu0 %v2445_v7 }
 0x676   :  { %1313 = vmatprep.subr.bf16.mxu1 %v2451_v8 }
 0x678   :  { %1273 = vmatpush1.bf16.msra.mxu0 %v2457_v9 }
 0x679   :  { %1314 = vmatpush1.bf16.msra.mxu1 %v2463_v10  ;;  %1274 = vmatprep.subr.bf16.mxu0 %v2469_v11 }
 0x67a   :  { %1315 = vmatprep.subr.bf16.mxu1 %v2475_v12 }
 0x67c   :  { %1275 = vmatpush1.bf16.msra.mxu0 %v2481_v13  ;;  %v1121_v13 = vadd.f32 %v1120_v47, %v2147_v60 }
 0x67d   :  { %1316 = vmatpush1.bf16.msra.mxu1 %v2487_v14  ;;  %1276 = vmatprep.subr.bf16.mxu0 %v2493_v15 }
 0x67e   :  { %1317 = vmatprep.subr.bf16.mxu1 %v2499_v16 }
 0x680   :  { %1277 = vmatpush1.bf16.msra.mxu0 %v2505_v17 }
 0x681   :  { %1318 = vmatpush1.bf16.msra.mxu1 %v2511_v18  ;;  %1278 = vmatprep.subr.bf16.mxu0 %v2517_v19 }
 0x682   :  { %1319 = vmatprep.subr.bf16.mxu1 %v2523_v20 }
 0x684   :  { %1279 = vmatpush1.bf16.msra.mxu0 %v2529_v21 }
 0x685   :  { %1320 = vmatpush1.bf16.msra.mxu1 %v2535_v22  ;;  %1280 = vmatprep.subr.bf16.mxu0 %v2541_v23 }
 0x686   :  { %1321 = vmatprep.subr.bf16.mxu1 %v2547_v24 }
 0x688   :  { %1281 = vmatpush1.bf16.msra.mxu0 %v2553_v25 }
 0x689   :  { %1322 = vmatpush1.bf16.msra.mxu1 %v2559_v26 }
 0x701   :  { %v1447_v1 = vpop.xlane.xlu1 %1446 }
 0x702   :  { %v1466_v37 = vadd.f32 %v2196_v41, %v1447_v1 }
 0x704   :  { %v1613_v38 = vmul.f32 -1.442695, %v1466_v37 }
 0x706   :  { %1783 = vpow2.f32 %v1613_v38 }
 0x710   :  { %v1784_v39 = vpop.eup %1783 }
 0x711   :  { %v1498_v40 = vadd.f32 1.0, %v1784_v39 }
 0x713   :  { %1785 = vrcp.f32 %v1498_v40 }
 0x71d   :  { %v1786_v43 = vpop.eup %1785 }
 0x71e   :  { %1523 = vst.msk [vmem:[%s2668_s5 + $0xa] sm:$0x3] %vm1517_vm1, %v1786_v43 }
 0x73e   :  { %v1157_v44 = vpop.f32.mrb[24].mxu0  ;;  %v1198_v46 = vpop.f32.mrb[24].mxu1 }
 0x73f   :  { %v1159_v49 = vpop.f32.mrb[25].mxu0  ;;  %v1200_v4 = vpop.f32.mrb[25].mxu1 }
 0x740   :  { %v1209_v7 = vcombine.low %v1157_v44, %v1159_v49  ;;  %v1210_v8 = vcombine.low %v1198_v46, %v1200_v4  ;;  %v1161_v41 = vpop.f32.mrb[26].mxu0  ;;  %v1202_v9 = vpop.f32.mrb[26].mxu1  ;;  %v1264_v44 = vadd.f32 %v1263_v59, %v2147_v60 }
 0x741   :  { %v1162_v10 = vpop.f32.mrb[27].mxu0  ;;  %v1203_v11 = vpop.f32.mrb[27].mxu1 }
 0x742   :  { %v1217_v12 = vrot.slane %v1209_v7, %v2140_v51  ;;  %v1224_v14 = vrot.slane %v1210_v8, %v2140_v51 }
 0x744   :  { %v1225_v15 = vcombine.low %v1217_v12, %v1224_v14 }
 0x746   :  { %v1227_v16 = vadd.f32 %v1225_v15, %v1121_v13 }
 0x748   :  { %v1599_v17 = vmul.f32 -1.442695, %v1227_v16  ;;  %v1235_v18 = vrot.slane %v1227_v16, 2  ;;  %v1246_v20 = vrot.slane %v1227_v16, 6  ;;  %v1243_v23 = vrot.slane %v1227_v16, 4 }
 0x74a   :  { %1787 = vpow2.f32 %v1599_v17  ;;  %v1600_v19 = vmul.f32 -1.442695, %v1235_v18  ;;  %v1601_v21 = vmul.f32 -1.442695, %v1246_v20 }
 0x74c   :  { %1789 = vpow2.f32 %v1600_v19 }
 0x74d   :  { %1791 = vpow2.f32 %v1601_v21 }
 0x754   :  { %v1788_v22 = vpop.eup %1787 }
 0x755   :  { %v1231_v24 = vadd.f32 1.0, %v1788_v22 }
 0x756   :  { %v1790_v25 = vpop.eup %1789 }
 0x757   :  { %1793 = vrcp.f32 %v1231_v24  ;;  %v1240_v26 = vadd.f32 1.0, %v1790_v25  ;;  %v1792_v5 = vpop.eup %1791 }
 0x758   :  { %1795 = vtanh.f32 %v1243_v23  ;;  %v1251_v48 = vadd.f32 1.0, %v1792_v5 }
 0x759   :  { %1797 = vrcp.f32 %v1240_v26 }
 0x75a   :  { %1799 = vrcp.f32 %v1251_v48 }
 0x761   :  { %v1794_v62 = vpop.eup %1793 }
 0x762   :  { %v1796_v2 = vpop.eup %1795 }
 0x763   :  { %v1798_v34 = vpop.eup %1797  ;;  %v1255_v3 = vmul.f32 %v1796_v2, %v1794_v62 }
 0x764   :  { %v1254_v35 = vmul.f32 %v1798_v34, %v2579_v55  ;;  %v1800_v45 = vpop.eup %1799 }
 0x766   :  { %v2626_v42 = vadd.f32 %v1255_v3, %v1254_v35 }
 0x768   :  { %1801 = vtanh.f32 %v2626_v42 }
 0x772   :  { %v1802_v53 = vpop.eup %1801 }
 0x773   :  { %v1258_v27 = vmul.f32 %v1802_v53, %v1800_v45 }
 0x775   :  { %1260 = vst [vmem:[#allocation4 + $0xc] sm:$0x3] %v1258_v27  ;;  %v1265_v28 = vpack.c.bf16 %v1258_v27, %v1258_v27 }
 0x777   :  { %1299 = vmatmul.mubr.bf16.vlgmr.msra.gmra.mrb[28].mxu0 %v1265_v28  ;;  %1340 = vmatmul.mubr.bf16.vlgmr.msra.gmra.mrb[28].mxu1 %v1265_v28 }
 0x77c   :  { %v1412_v29 = vld [vmem:[#allocation4 + $0xc] sm:$0x3] }
 0x77d   :  { %v1427_v31 = vmul.f32 %v2632_v30, %v1412_v29 }
 0x77f   :  { %v1448_v32 = vsel %vm1429_vm0, %v1427_v31, 0.0 }
 0x780   :  { %1449 = vadd.xlane.f32.xlu0 %v1448_v32 }
 0x80d   :  { %v1450_v6 = vpop.xlane.xlu0 %1449 }
 0x80e   :  { %v1467_v0 = vadd.f32 %v2636_v33, %v1450_v6 }
 0x810   :  { %v1614_v50 = vmul.f32 -1.442695, %v1467_v0 }
 0x812   :  { %1803 = vpow2.f32 %v1614_v50 }
 0x81c   :  { %v1804_v52 = vpop.eup %1803 }
 0x81d   :  { %v1499_v54 = vadd.f32 1.0, %v1804_v52 }
 0x81f   :  { %1805 = vrcp.f32 %v1499_v54 }
 0x829   :  { %v1806_v55 = vpop.eup %1805 }
 0x82a   :  { %1524 = vst.msk [vmem:[%s2668_s5 + $0xc] sm:$0x3] %vm1517_vm1, %v1806_v55 }
 0x84a   :  { %v1300_v57 = vpop.f32.mrb[28].mxu0  ;;  %v1341_v58 = vpop.f32.mrb[28].mxu1 }
 0x84b   :  { %v1302_v63 = vpop.f32.mrb[29].mxu0  ;;  %v1343_v61 = vpop.f32.mrb[29].mxu1 }
 0x84c   :  { %v1352_v36 = vcombine.low %v1300_v57, %v1302_v63  ;;  %v1353_v1 = vcombine.low %v1341_v58, %v1343_v61  ;;  %v1304_v37 = vpop.f32.mrb[30].mxu0  ;;  %v1345_v38 = vpop.f32.mrb[30].mxu1 }
 0x84d   :  { %v1305_v39 = vpop.f32.mrb[31].mxu0  ;;  %v1346_v40 = vpop.f32.mrb[31].mxu1 }
 0x84e   :  { %v1360_v43 = vrot.slane %v1352_v36, %v2140_v51  ;;  %v1367_v46 = vrot.slane %v1353_v1, %v2140_v51 }
 0x850   :  { %v1368_v47 = vcombine.low %v1360_v43, %v1367_v46 }
 0x852   :  { %v1370_v49 = vadd.f32 %v1368_v47, %v1264_v44 }
 0x854   :  { %v1603_v4 = vmul.f32 -1.442695, %v1370_v49  ;;  %v1378_v7 = vrot.slane %v1370_v49, 2  ;;  %v1389_v41 = vrot.slane %v1370_v49, 6  ;;  %v1386_v11 = vrot.slane %v1370_v49, 4 }
 0x856   :  { %1807 = vpow2.f32 %v1603_v4  ;;  %v1604_v8 = vmul.f32 -1.442695, %v1378_v7  ;;  %v1605_v9 = vmul.f32 -1.442695, %v1389_v41 }
 0x858   :  { %1809 = vpow2.f32 %v1604_v8 }
 0x859   :  { %1811 = vpow2.f32 %v1605_v9 }
 0x860   :  { %v1808_v10 = vpop.eup %1807 }
 0x861   :  { %v1374_v12 = vadd.f32 1.0, %v1808_v10 }
 0x862   :  { %v1810_v13 = vpop.eup %1809 }
 0x863   :  { %1813 = vrcp.f32 %v1374_v12  ;;  %v1383_v14 = vadd.f32 1.0, %v1810_v13  ;;  %v1812_v60 = vpop.eup %1811 }
 0x864   :  { %1815 = vtanh.f32 %v1386_v11  ;;  %v1394_v17 = vadd.f32 1.0, %v1812_v60 }
 0x865   :  { %1817 = vrcp.f32 %v1383_v14 }
 0x866   :  { %1819 = vrcp.f32 %v1394_v17 }
 0x86d   :  { %v1814_v51 = vpop.eup %1813 }
 0x86e   :  { %v1816_v15 = vpop.eup %1815 }
 0x86f   :  { %v1818_v16 = vpop.eup %1817  ;;  %v1398_v19 = vmul.f32 %v1816_v15, %v1814_v51 }
 0x870   :  { %v1397_v18 = vmul.f32 %v1818_v16, %v2626_v42  ;;  %v1820_v21 = vpop.eup %1819 }
 0x872   :  { %v1399_v20 = vadd.f32 %v1398_v19, %v1397_v18 }
 0x874   :  { %1821 = vtanh.f32 %v1399_v20  ;;  %1405 = vst [vmem:[#allocation3] sm:$0x3] %v1399_v20  ;;  %1530 = vst [vmem:[%s2669_s7] sm:$0x3] %v1399_v20 }
 0x87e   :  { %v1822_v22 = vpop.eup %1821 }
 0x87f   :  { %v1401_v23 = vmul.f32 %v1822_v22, %v1820_v21 }
 0x881   :  { %1403 = vst [vmem:[#allocation4 + $0xe] sm:$0x3] %v1401_v23  ;;  %1404 = vst [vmem:[#allocation2] sm:$0x3] %v1401_v23 }
 0x882   :  { %1529 = vst [vmem:[%s2670_s6] sm:$0x3] %v1401_v23 }
 0x888   :  { %v1413_v24 = vld [vmem:[#allocation4 + $0xe] sm:$0x3] }
 0x889   :  { %v1428_v25 = vmul.f32 %v2632_v30, %v1413_v24 }
 0x88b   :  { %v1451_v26 = vsel %vm1429_vm0, %v1428_v25, 0.0 }
 0x88c   :  { %1452 = vadd.xlane.f32.xlu1 %v1451_v26 }
 0x919   :  { %v1453_v5 = vpop.xlane.xlu1 %1452 }
 0x91a   :  { %v1468_v62 = vadd.f32 %v2636_v33, %v1453_v5 }
 0x91c   :  { %v1615_v2 = vmul.f32 -1.442695, %v1468_v62 }
 0x91e   :  { %1823 = vpow2.f32 %v1615_v2 }
 0x928   :  { %v1824_v34 = vpop.eup %1823 }
 0x929   :  { %v1500_v48 = vadd.f32 1.0, %v1824_v34 }
 0x92b   :  { %1825 = vrcp.f32 %v1500_v48 }
 0x935   :  { %v1826_v35 = vpop.eup %1825 }
 0x936   :  { %1525 = vst.msk [vmem:[%s2668_s5 + $0xe] sm:$0x3] %vm1517_vm1, %v1826_v35 }

</bundles_post_ra>
